<compile_context>
chip_gen: v5e
topology: v5e:2x2
jax: 0.10.0
libtpu: 0.0.40
codegen_flags: <defaults>
</compile_context>

<pallas_src>
import functools

import jax
import jax.numpy as jnp
import numpy as np
from jax.experimental import pallas as pl
from jax.experimental.pallas import tpu as pltpu


def _f_conv_kernel(x_ref,      # (NB*C, Lext)   guarded, flattened, zero-padded input
                   dw_ref,     # (NB*C, 32)     packed depthwise params, tiled per image
                   w2_ref,     # (NB*Ch, 3*NB*C) block-diag-tiled conv2 weight
                   b2_ref,     # (NB*Ch, 1)
                   w3_ref,     # (NB*Co, NB*Ch)  block-diag-tiled conv3 weight
                   b3_ref,     # (NB*Co, 1)
                   mask_ref,   # (1, Lm)        0 on the two padding columns of each row
                   gamma_ref,  # (1,) in SMEM
                   out_ref,    # (NB*Co, Lm)    interior rows only (lane-dense store)
                   t_ref,      # scratch (NB*C, Lm + 2*Q): guarded chained-conv buffer
                   *, Wp, S, Q, Lm):
    f32 = jnp.float32
    # 3x3 tap offsets on the flattened padded grid (row stride Wp).
    offs = [(ky - 1) * Wp + (kx - 1) for ky in range(3) for kx in range(3)]
    mask = mask_ref[...]                                  # (1, Lm)

    # ---- Xception depthwise front-end, on the interior-rows slab ------------
    xc = x_ref[:, S:S + Lm]                               # (NB*C, Lm) unshifted view
    x1 = xc * dw_ref[:, 0:1] + dw_ref[:, 1:2]             # depthwise 1x1

    x2 = None                                             # depthwise 3x3
    t = None                                              # 1st conv of the chained pair
    for i, k in enumerate(offs):                          # fused: 1 load feeds both
        xs = xc if k == 0 else x_ref[:, S + k:S + k + Lm]
        p2 = xs * dw_ref[:, 2 + i:3 + i]
        p3 = xs * dw_ref[:, 12 + i:13 + i]
        x2 = p2 if x2 is None else x2 + p2
        t = p3 if t is None else t + p3
    x2 = x2 + dw_ref[:, 11:12]
    # PyTorch zero-pads the 1st chained conv's HxW output before the 2nd conv:
    # the mask zeroes the two padding columns; the padding rows live in the
    # scratch guard strips which are zeroed below.
    t = (t + dw_ref[:, 21:22]) * mask

    # Guarded scratch: zero ONLY the two Q-wide guard strips (cheap, megacore-
    # safe every step) and overwrite the interior -- no full-buffer zeroing.
    zg = jnp.zeros((t_ref.shape[0], Q), f32)
    t_ref[:, :Q] = zg
    t_ref[:, Q + Lm:] = zg
    t_ref[:, Q:Q + Lm] = t

    x3 = None                                             # 2nd conv of the chained pair
    for i, k in enumerate(offs):
        p = t_ref[:, Q + k:Q + k + Lm] * dw_ref[:, 22 + i:23 + i]
        x3 = p if x3 is None else x3 + p
    x3 = x3 + dw_ref[:, 31:32]

    # ---- 1x1 convs on the MXU (block-diag weights fold all NB images) -------
    cat = jnp.concatenate([x1, x2, x3], axis=0)           # (3*NB*C, Lm)
    h = jnp.dot(w2_ref[...], cat, preferred_element_type=f32) + b2_ref[...]
    h = jnp.where(h >= 0, h, 0.1 * h)                     # LeakyReLU(0.1)
    o = jnp.dot(w3_ref[...], h, preferred_element_type=f32) + b3_ref[...]
    out_ref[...] = (o * gamma_ref[0]).astype(out_ref.dtype)


def _vmem_budget_bytes():
    """Generation-aware VMEM budget (v7x: 64 MiB/TC vs 128 MiB on v5e/v6e)."""
    try:
        cap = pltpu.get_tpu_info().vmem_capacity_bytes
    except Exception:
        cap = 64 << 20
    return min(cap // 2, 48 << 20)


def _pick_images_per_step(n_images, C, Co, Lext, Lm):
    """Images folded into one grid step.

    Constraints: NB divides N; the (NB*C, .) input and (NB*Co, .) output block
    row counts are sublane-aligned (multiple of 8) unless the block spans the
    whole batch (block == full array dim is always legal); the per-step VMEM
    footprint fits the generation-aware budget.  Prefer >= 2 grid steps so both
    v7x TensorCores get work.
    """
    budget = (_vmem_budget_bytes() * 3) // 4

    def valid(nb):
        if n_images % nb:
            return False
        return nb == n_images or (nb * C % 8 == 0 and nb * Co % 8 == 0)

    def footprint(nb):
        # 2x double-buffered input block + 2x output block + scratch + ~8 live
        # (NB*C, Lm)-sized f32 temporaries.
        return 4 * nb * (3 * C * Lext + 2 * Co * Lm + 8 * C * Lm)

    cands = [nb for nb in range(1, n_images + 1) if valid(nb)]
    fits = [nb for nb in cands if footprint(nb) <= budget] or [min(cands)]
    multi = [nb for nb in fits if n_images // nb >= 2]
    return max(multi) if multi else max(fits)


def _block_diag_tile(w, nb):
    """(O, I) -> (nb*O, nb*I) block-diagonal tiling (image-major on both axes)."""
    O, I = w.shape
    eye = jnp.eye(nb, dtype=w.dtype)
    return (eye[:, None, :, None] * w[None, :, None, :]).reshape(nb * O, nb * I)


def f_conv_forward(x_nchw, params, *, images_per_step=None):
    """F_conv forward. x_nchw: (N, C, H, W) float32 -> (N, channel, H, W)."""
    N, C, H, W = x_nchw.shape
    Ch = params["wc2"].shape[0]
    Co = params["wc3"].shape[0]
    Wp = W + 2
    Lm = H * Wp                      # interior-rows slab (lane-dense work & store)
    Lext = (H + 6) * Wp              # one fused pad: conv ring + flat tap guards
    S = 3 * Wp                       # slab offset inside the guarded input row
    Q = Wp + 1                       # guard width of the chained-conv scratch

    NB = images_per_step or _pick_images_per_step(N, C, Co, Lext, Lm)
    G = N // NB
    NBC = NB * C

    # Single XLA pad (replaces spatial pad + flat-guard pad); reshape is free.
    x = x_nchw.astype(jnp.float32)
    xe = jnp.pad(x, ((0, 0), (0, 0), (3, 3), (1, 1))).reshape(N * C, Lext)

    # Packed per-channel depthwise params, tiled NB times (hoisted, tiny):
    #   [w1 | b1 | w2(9) | b2 | w3a(9) | b3a | w3b(9) | b3b]
    dwp = jnp.concatenate([
        params["w1"][:, None], params["b1"][:, None],
        params["w2"].reshape(C, 9), params["b2"][:, None],
        params["w3a"].reshape(C, 9), params["b3a"][:, None],
        params["w3b"].reshape(C, 9), params["b3b"][:, None],
    ], axis=1).astype(jnp.float32)
    dwp = jnp.tile(dwp, (NB, 1))                                    # (NB*C, 32)

    # Block-diagonal-tiled 1x1-conv weights so all NB images share one matmul.
    wc2 = params["wc2"].astype(jnp.float32)                         # (Ch, 3C)
    w2b = jnp.concatenate(
        [_block_diag_tile(wc2[:, s * C:(s + 1) * C], NB) for s in range(3)],
        axis=1)                                                     # (NB*Ch, 3*NB*C)
    b2b = jnp.tile(params["bc2"].astype(jnp.float32), NB)[:, None]  # (NB*Ch, 1)
    w3b = _block_diag_tile(params["wc3"].astype(jnp.float32), NB)   # (NB*Co, NB*Ch)
    b3b = jnp.tile(params["bc3"].astype(jnp.float32), NB)[:, None]  # (NB*Co, 1)

    # Zero the two padding columns of each interior row of the intermediate.
    m = np.ones((H, Wp), np.float32)
    m[:, 0] = 0.0
    m[:, Wp - 1] = 0.0
    mask = jnp.asarray(m.reshape(1, Lm))

    gamma = jnp.reshape(params["gamma"], (1,)).astype(jnp.float32)

    kernel = functools.partial(_f_conv_kernel, Wp=Wp, S=S, Q=Q, Lm=Lm)

    out_flat = pl.pallas_call(
        kernel,
        out_shape=jax.ShapeDtypeStruct((N * Co, Lm), jnp.float32),
        grid=(G,),
        in_specs=[
            pl.BlockSpec((NBC, Lext), lambda n: (n, 0)),
            pl.BlockSpec((NBC, 32), lambda n: (0, 0)),
            pl.BlockSpec((NB * Ch, 3 * NBC), lambda n: (0, 0)),
            pl.BlockSpec((NB * Ch, 1), lambda n: (0, 0)),
            pl.BlockSpec((NB * Co, NB * Ch), lambda n: (0, 0)),
            pl.BlockSpec((NB * Co, 1), lambda n: (0, 0)),
            pl.BlockSpec((1, Lm), lambda n: (0, 0)),
            pl.BlockSpec(memory_space=pltpu.MemorySpace.SMEM),
        ],
        out_specs=pl.BlockSpec((NB * Co, Lm), lambda n: (n, 0)),
        scratch_shapes=[pltpu.VMEM((NBC, Lm + 2 * Q), jnp.float32)],
        compiler_params=pltpu.CompilerParams(
            dimension_semantics=("parallel",),
            vmem_limit_bytes=_vmem_budget_bytes(),
        ),
    )(xe, dwp, w2b, b2b, w3b, b3b, mask, gamma)

    # Only the two padding columns remain to trim (padding rows never stored).
    return out_flat.reshape(N, Co, H, Wp)[:, :, :, 1:W + 1]


def make_params(key, in_channel, channel, channels_hidden=None):
    """Deterministic parameter init matching F_conv.__init__ shapes."""
    if channels_hidden is None:
        channels_hidden = channel
    C, Ch, Co = in_channel, channels_hidden, channel
    ks = jax.random.split(key, 12)
    u = lambda k, shape, s=0.2: jax.random.uniform(k, shape, jnp.float32, -s, s)
    return {
        # Xception depthwise params: torch (C,1,k,k) weights stored as (C,) / (C,3,3).
        "w1": u(ks[0], (C,)), "b1": u(ks[1], (C,)),
        "w2": u(ks[2], (C, 3, 3)), "b2": u(ks[3], (C,)),
        "w3a": u(ks[4], (C, 3, 3)), "b3a": u(ks[5], (C,)),
        "w3b": u(ks[6], (C, 3, 3)), "b3b": u(ks[7], (C,)),
        # conv2: torch (Ch, 3C, 1, 1) -> (Ch, 3C);  conv3: (Co, Ch, 1, 1) -> (Co, Ch).
        "wc2": u(ks[8], (Ch, 3 * C)), "bc2": u(ks[9], (Ch,)),
        "wc3": u(ks[10], (Co, Ch)), "bc3": u(ks[11], (Co,)),
        "gamma": jnp.ones((1,), jnp.float32),
    }


def _reference_forward(x, params):
    """Pure-JAX reference (lax convs, HIGHEST precision) for verification."""
    C = x.shape[1]
    hp = jax.lax.Precision.HIGHEST

    def dw3(xin, w, b):
        out = jax.lax.conv_general_dilated(
            xin, w[:, None, :, :], (1, 1), [(1, 1), (1, 1)],
            dimension_numbers=("NCHW", "OIHW", "NCHW"),
            feature_group_count=C, precision=hp)
        return out + b[None, :, None, None]

    x1 = x * params["w1"][None, :, None, None] + params["b1"][None, :, None, None]
    x2 = dw3(x, params["w2"], params["b2"])
    x3 = dw3(dw3(x, params["w3a"], params["b3a"]), params["w3b"], params["b3b"])
    cat = jnp.concatenate([x1, x2, x3], axis=1)
    h = jnp.einsum("nchw,dc->ndhw", cat, params["wc2"], precision=hp) \
        + params["bc2"][None, :, None, None]
    h = jnp.where(h >= 0, h, 0.1 * h)
    o = jnp.einsum("nchw,dc->ndhw", h, params["wc3"], precision=hp) \
        + params["bc3"][None, :, None, None]
    return o * params["gamma"][0]


if __name__ == "__main__":
    key = jax.random.PRNGKey(0)
    k_x, k_p = jax.random.split(key)

    in_channel = 4
    channel = 4            # channels_hidden defaults to channel
    N, H, W = 2, 16, 16

    x = jax.random.normal(k_x, (N, in_channel, H, W), jnp.float32)
    params = make_params(k_p, in_channel, channel)

    out = jax.block_until_ready(f_conv_forward(x, params))
    ref = jax.block_until_ready(_reference_forward(x, params))

    assert out.shape == (N, channel, H, W)
    # Tolerance sized for the MXU's multi-pass f32 matmul vs the HIGHEST-
    # precision reference; structural errors would be orders of magnitude larger.
    err = float(jnp.max(jnp.abs(out - ref)))
    assert err < 5e-3, f"mismatch vs reference: max abs err {err}"
    print("KERNEL_OK")
</pallas_src>

<mosaic_0001>
module attributes {stable_mosaic.version = 11 : i64} {
  func.func @_f_conv_kernel(%arg0: i32, %arg1: memref<8x396xf32, #tpu.memory_space<vmem>>, %arg2: memref<8x32xf32, #tpu.memory_space<vmem>>, %arg3: memref<8x24xf32, #tpu.memory_space<vmem>>, %arg4: memref<8x1xf32, #tpu.memory_space<vmem>>, %arg5: memref<8x8xf32, #tpu.memory_space<vmem>>, %arg6: memref<8x1xf32, #tpu.memory_space<vmem>>, %arg7: memref<1x288xf32, #tpu.memory_space<vmem>>, %arg8: memref<1xf32, #tpu.memory_space<smem>>, %arg9: memref<8x288xf32, #tpu.memory_space<vmem>>, %arg10: memref<8x326xf32, #tpu.memory_space<vmem>>) attributes {dimension_semantics = [#tpu.dimension_semantics<parallel>], iteration_bounds = array<i64: 1>, scalar_prefetch = 0 : i64, scratch_operands = 1 : i64, tpu.core_type = #tpu.core_type<tc>, window_params = [{transform_indices = @transform_0, window_bounds = array<i64: 8, 396>}, {pipeline_mode = #tpu.pipeline_mode<synchronous>, transform_indices = @transform_1, window_bounds = array<i64: 8, 32>}, {pipeline_mode = #tpu.pipeline_mode<synchronous>, transform_indices = @transform_2, window_bounds = array<i64: 8, 24>}, {pipeline_mode = #tpu.pipeline_mode<synchronous>, transform_indices = @transform_3, window_bounds = array<i64: 8, 1>}, {pipeline_mode = #tpu.pipeline_mode<synchronous>, transform_indices = @transform_4, window_bounds = array<i64: 8, 8>}, {pipeline_mode = #tpu.pipeline_mode<synchronous>, transform_indices = @transform_5, window_bounds = array<i64: 8, 1>}, {pipeline_mode = #tpu.pipeline_mode<synchronous>, transform_indices = @transform_6, window_bounds = array<i64: 1, 288>}, {transform_indices = @transform_7, window_bounds = array<i64: 1>}, {transform_indices = @transform_8, window_bounds = array<i64: 8, 288>}]} {
    %c0 = arith.constant 0 : index
    %c0_0 = arith.constant 0 : index
    %0 = vector.load %arg7[%c0, %c0_0] : memref<1x288xf32, #tpu.memory_space<vmem>>, vector<1x288xf32>
    %c0_1 = arith.constant 0 : index
    %c54 = arith.constant 54 : index
    %1 = vector.load %arg1[%c0_1, %c54] : memref<8x396xf32, #tpu.memory_space<vmem>>, vector<8x288xf32>
    %c0_2 = arith.constant 0 : index
    %c0_3 = arith.constant 0 : index
    %2 = vector.load %arg2[%c0_2, %c0_3] : memref<8x32xf32, #tpu.memory_space<vmem>>, vector<8x1xf32>
    %3 = vector.broadcast %2 : vector<8x1xf32> to vector<8x288xf32>
    %4 = arith.mulf %1, %3 : vector<8x288xf32>
    %c0_4 = arith.constant 0 : index
    %c1 = arith.constant 1 : index
    %5 = vector.load %arg2[%c0_4, %c1] : memref<8x32xf32, #tpu.memory_space<vmem>>, vector<8x1xf32>
    %6 = vector.broadcast %5 : vector<8x1xf32> to vector<8x288xf32>
    %7 = arith.addf %4, %6 : vector<8x288xf32>
    %c0_5 = arith.constant 0 : index
    %c35 = arith.constant 35 : index
    %8 = vector.load %arg1[%c0_5, %c35] : memref<8x396xf32, #tpu.memory_space<vmem>>, vector<8x288xf32>
    %c0_6 = arith.constant 0 : index
    %c2 = arith.constant 2 : index
    %9 = vector.load %arg2[%c0_6, %c2] : memref<8x32xf32, #tpu.memory_space<vmem>>, vector<8x1xf32>
    %10 = vector.broadcast %9 : vector<8x1xf32> to vector<8x288xf32>
    %11 = arith.mulf %8, %10 : vector<8x288xf32>
    %c0_7 = arith.constant 0 : index
    %c12 = arith.constant 12 : index
    %12 = vector.load %arg2[%c0_7, %c12] : memref<8x32xf32, #tpu.memory_space<vmem>>, vector<8x1xf32>
    %13 = vector.broadcast %12 : vector<8x1xf32> to vector<8x288xf32>
    %14 = arith.mulf %8, %13 : vector<8x288xf32>
    %c0_8 = arith.constant 0 : index
    %c36 = arith.constant 36 : index
    %15 = vector.load %arg1[%c0_8, %c36] : memref<8x396xf32, #tpu.memory_space<vmem>>, vector<8x288xf32>
    %c0_9 = arith.constant 0 : index
    %c3 = arith.constant 3 : index
    %16 = vector.load %arg2[%c0_9, %c3] : memref<8x32xf32, #tpu.memory_space<vmem>>, vector<8x1xf32>
    %17 = vector.broadcast %16 : vector<8x1xf32> to vector<8x288xf32>
    %18 = arith.mulf %15, %17 : vector<8x288xf32>
    %c0_10 = arith.constant 0 : index
    %c13 = arith.constant 13 : index
    %19 = vector.load %arg2[%c0_10, %c13] : memref<8x32xf32, #tpu.memory_space<vmem>>, vector<8x1xf32>
    %20 = vector.broadcast %19 : vector<8x1xf32> to vector<8x288xf32>
    %21 = arith.mulf %15, %20 : vector<8x288xf32>
    %22 = arith.addf %11, %18 : vector<8x288xf32>
    %23 = arith.addf %14, %21 : vector<8x288xf32>
    %c0_11 = arith.constant 0 : index
    %c37 = arith.constant 37 : index
    %24 = vector.load %arg1[%c0_11, %c37] : memref<8x396xf32, #tpu.memory_space<vmem>>, vector<8x288xf32>
    %c0_12 = arith.constant 0 : index
    %c4 = arith.constant 4 : index
    %25 = vector.load %arg2[%c0_12, %c4] : memref<8x32xf32, #tpu.memory_space<vmem>>, vector<8x1xf32>
    %26 = vector.broadcast %25 : vector<8x1xf32> to vector<8x288xf32>
    %27 = arith.mulf %24, %26 : vector<8x288xf32>
    %c0_13 = arith.constant 0 : index
    %c14 = arith.constant 14 : index
    %28 = vector.load %arg2[%c0_13, %c14] : memref<8x32xf32, #tpu.memory_space<vmem>>, vector<8x1xf32>
    %29 = vector.broadcast %28 : vector<8x1xf32> to vector<8x288xf32>
    %30 = arith.mulf %24, %29 : vector<8x288xf32>
    %31 = arith.addf %22, %27 : vector<8x288xf32>
    %32 = arith.addf %23, %30 : vector<8x288xf32>
    %c0_14 = arith.constant 0 : index
    %c53 = arith.constant 53 : index
    %33 = vector.load %arg1[%c0_14, %c53] : memref<8x396xf32, #tpu.memory_space<vmem>>, vector<8x288xf32>
    %c0_15 = arith.constant 0 : index
    %c5 = arith.constant 5 : index
    %34 = vector.load %arg2[%c0_15, %c5] : memref<8x32xf32, #tpu.memory_space<vmem>>, vector<8x1xf32>
    %35 = vector.broadcast %34 : vector<8x1xf32> to vector<8x288xf32>
    %36 = arith.mulf %33, %35 : vector<8x288xf32>
    %c0_16 = arith.constant 0 : index
    %c15 = arith.constant 15 : index
    %37 = vector.load %arg2[%c0_16, %c15] : memref<8x32xf32, #tpu.memory_space<vmem>>, vector<8x1xf32>
    %38 = vector.broadcast %37 : vector<8x1xf32> to vector<8x288xf32>
    %39 = arith.mulf %33, %38 : vector<8x288xf32>
    %40 = arith.addf %31, %36 : vector<8x288xf32>
    %41 = arith.addf %32, %39 : vector<8x288xf32>
    %c0_17 = arith.constant 0 : index
    %c6 = arith.constant 6 : index
    %42 = vector.load %arg2[%c0_17, %c6] : memref<8x32xf32, #tpu.memory_space<vmem>>, vector<8x1xf32>
    %43 = vector.broadcast %42 : vector<8x1xf32> to vector<8x288xf32>
    %44 = arith.mulf %1, %43 : vector<8x288xf32>
    %c0_18 = arith.constant 0 : index
    %c16 = arith.constant 16 : index
    %45 = vector.load %arg2[%c0_18, %c16] : memref<8x32xf32, #tpu.memory_space<vmem>>, vector<8x1xf32>
    %46 = vector.broadcast %45 : vector<8x1xf32> to vector<8x288xf32>
    %47 = arith.mulf %1, %46 : vector<8x288xf32>
    %48 = arith.addf %40, %44 : vector<8x288xf32>
    %49 = arith.addf %41, %47 : vector<8x288xf32>
    %c0_19 = arith.constant 0 : index
    %c55 = arith.constant 55 : index
    %50 = vector.load %arg1[%c0_19, %c55] : memref<8x396xf32, #tpu.memory_space<vmem>>, vector<8x288xf32>
    %c0_20 = arith.constant 0 : index
    %c7 = arith.constant 7 : index
    %51 = vector.load %arg2[%c0_20, %c7] : memref<8x32xf32, #tpu.memory_space<vmem>>, vector<8x1xf32>
    %52 = vector.broadcast %51 : vector<8x1xf32> to vector<8x288xf32>
    %53 = arith.mulf %50, %52 : vector<8x288xf32>
    %c0_21 = arith.constant 0 : index
    %c17 = arith.constant 17 : index
    %54 = vector.load %arg2[%c0_21, %c17] : memref<8x32xf32, #tpu.memory_space<vmem>>, vector<8x1xf32>
    %55 = vector.broadcast %54 : vector<8x1xf32> to vector<8x288xf32>
    %56 = arith.mulf %50, %55 : vector<8x288xf32>
    %57 = arith.addf %48, %53 : vector<8x288xf32>
    %58 = arith.addf %49, %56 : vector<8x288xf32>
    %c0_22 = arith.constant 0 : index
    %c71 = arith.constant 71 : index
    %59 = vector.load %arg1[%c0_22, %c71] : memref<8x396xf32, #tpu.memory_space<vmem>>, vector<8x288xf32>
    %c0_23 = arith.constant 0 : index
    %c8 = arith.constant 8 : index
    %60 = vector.load %arg2[%c0_23, %c8] : memref<8x32xf32, #tpu.memory_space<vmem>>, vector<8x1xf32>
    %61 = vector.broadcast %60 : vector<8x1xf32> to vector<8x288xf32>
    %62 = arith.mulf %59, %61 : vector<8x288xf32>
    %c0_24 = arith.constant 0 : index
    %c18 = arith.constant 18 : index
    %63 = vector.load %arg2[%c0_24, %c18] : memref<8x32xf32, #tpu.memory_space<vmem>>, vector<8x1xf32>
    %64 = vector.broadcast %63 : vector<8x1xf32> to vector<8x288xf32>
    %65 = arith.mulf %59, %64 : vector<8x288xf32>
    %66 = arith.addf %57, %62 : vector<8x288xf32>
    %67 = arith.addf %58, %65 : vector<8x288xf32>
    %c0_25 = arith.constant 0 : index
    %c72 = arith.constant 72 : index
    %68 = vector.load %arg1[%c0_25, %c72] : memref<8x396xf32, #tpu.memory_space<vmem>>, vector<8x288xf32>
    %c0_26 = arith.constant 0 : index
    %c9 = arith.constant 9 : index
    %69 = vector.load %arg2[%c0_26, %c9] : memref<8x32xf32, #tpu.memory_space<vmem>>, vector<8x1xf32>
    %70 = vector.broadcast %69 : vector<8x1xf32> to vector<8x288xf32>
    %71 = arith.mulf %68, %70 : vector<8x288xf32>
    %c0_27 = arith.constant 0 : index
    %c19 = arith.constant 19 : index
    %72 = vector.load %arg2[%c0_27, %c19] : memref<8x32xf32, #tpu.memory_space<vmem>>, vector<8x1xf32>
    %73 = vector.broadcast %72 : vector<8x1xf32> to vector<8x288xf32>
    %74 = arith.mulf %68, %73 : vector<8x288xf32>
    %75 = arith.addf %66, %71 : vector<8x288xf32>
    %76 = arith.addf %67, %74 : vector<8x288xf32>
    %c0_28 = arith.constant 0 : index
    %c73 = arith.constant 73 : index
    %77 = vector.load %arg1[%c0_28, %c73] : memref<8x396xf32, #tpu.memory_space<vmem>>, vector<8x288xf32>
    %c0_29 = arith.constant 0 : index
    %c10 = arith.constant 10 : index
    %78 = vector.load %arg2[%c0_29, %c10] : memref<8x32xf32, #tpu.memory_space<vmem>>, vector<8x1xf32>
    %79 = vector.broadcast %78 : vector<8x1xf32> to vector<8x288xf32>
    %80 = arith.mulf %77, %79 : vector<8x288xf32>
    %c0_30 = arith.constant 0 : index
    %c20 = arith.constant 20 : index
    %81 = vector.load %arg2[%c0_30, %c20] : memref<8x32xf32, #tpu.memory_space<vmem>>, vector<8x1xf32>
    %82 = vector.broadcast %81 : vector<8x1xf32> to vector<8x288xf32>
    %83 = arith.mulf %77, %82 : vector<8x288xf32>
    %84 = arith.addf %75, %80 : vector<8x288xf32>
    %85 = arith.addf %76, %83 : vector<8x288xf32>
    %c0_31 = arith.constant 0 : index
    %c11 = arith.constant 11 : index
    %86 = vector.load %arg2[%c0_31, %c11] : memref<8x32xf32, #tpu.memory_space<vmem>>, vector<8x1xf32>
    %87 = vector.broadcast %86 : vector<8x1xf32> to vector<8x288xf32>
    %88 = arith.addf %84, %87 : vector<8x288xf32>
    %c0_32 = arith.constant 0 : index
    %c21 = arith.constant 21 : index
    %89 = vector.load %arg2[%c0_32, %c21] : memref<8x32xf32, #tpu.memory_space<vmem>>, vector<8x1xf32>
    %90 = vector.broadcast %89 : vector<8x1xf32> to vector<8x288xf32>
    %91 = arith.addf %85, %90 : vector<8x288xf32>
    %92 = vector.broadcast %0 : vector<1x288xf32> to vector<8x288xf32>
    %93 = arith.mulf %91, %92 : vector<8x288xf32>
    %cst = arith.constant 0.000000e+00 : f32
    %94 = vector.broadcast %cst : f32 to vector<8x19xf32>
    %c0_33 = arith.constant 0 : index
    %c0_34 = arith.constant 0 : index
    %95 = vector.load %arg10[%c0_33, %c0_34] : memref<8x326xf32, #tpu.memory_space<vmem>>, vector<8x19xf32>
    tpu.vector_store %arg10[%c0_33, %c0_34], %94 {strides = array<i32>} : memref<8x326xf32, #tpu.memory_space<vmem>>, vector<8x19xf32>,
    %c0_35 = arith.constant 0 : index
    %c307 = arith.constant 307 : index
    %96 = vector.load %arg10[%c0_35, %c307] : memref<8x326xf32, #tpu.memory_space<vmem>>, vector<8x19xf32>
    tpu.vector_store %arg10[%c0_35, %c307], %94 {strides = array<i32>} : memref<8x326xf32, #tpu.memory_space<vmem>>, vector<8x19xf32>,
    %c0_36 = arith.constant 0 : index
    %c19_37 = arith.constant 19 : index
    %97 = vector.load %arg10[%c0_36, %c19_37] : memref<8x326xf32, #tpu.memory_space<vmem>>, vector<8x288xf32>
    tpu.vector_store %arg10[%c0_36, %c19_37], %93 {strides = array<i32>} : memref<8x326xf32, #tpu.memory_space<vmem>>, vector<8x288xf32>,
    %c0_38 = arith.constant 0 : index
    %c0_39 = arith.constant 0 : index
    %98 = vector.load %arg10[%c0_38, %c0_39] : memref<8x326xf32, #tpu.memory_space<vmem>>, vector<8x288xf32>
    %c0_40 = arith.constant 0 : index
    %c22 = arith.constant 22 : index
    %99 = vector.load %arg2[%c0_40, %c22] : memref<8x32xf32, #tpu.memory_space<vmem>>, vector<8x1xf32>
    %100 = vector.broadcast %99 : vector<8x1xf32> to vector<8x288xf32>
    %101 = arith.mulf %98, %100 : vector<8x288xf32>
    %c0_41 = arith.constant 0 : index
    %c1_42 = arith.constant 1 : index
    %102 = vector.load %arg10[%c0_41, %c1_42] : memref<8x326xf32, #tpu.memory_space<vmem>>, vector<8x288xf32>
    %c0_43 = arith.constant 0 : index
    %c23 = arith.constant 23 : index
    %103 = vector.load %arg2[%c0_43, %c23] : memref<8x32xf32, #tpu.memory_space<vmem>>, vector<8x1xf32>
    %104 = vector.broadcast %103 : vector<8x1xf32> to vector<8x288xf32>
    %105 = arith.mulf %102, %104 : vector<8x288xf32>
    %106 = arith.addf %101, %105 : vector<8x288xf32>
    %c0_44 = arith.constant 0 : index
    %c2_45 = arith.constant 2 : index
    %107 = vector.load %arg10[%c0_44, %c2_45] : memref<8x326xf32, #tpu.memory_space<vmem>>, vector<8x288xf32>
    %c0_46 = arith.constant 0 : index
    %c24 = arith.constant 24 : index
    %108 = vector.load %arg2[%c0_46, %c24] : memref<8x32xf32, #tpu.memory_space<vmem>>, vector<8x1xf32>
    %109 = vector.broadcast %108 : vector<8x1xf32> to vector<8x288xf32>
    %110 = arith.mulf %107, %109 : vector<8x288xf32>
    %111 = arith.addf %106, %110 : vector<8x288xf32>
    %c0_47 = arith.constant 0 : index
    %c18_48 = arith.constant 18 : index
    %112 = vector.load %arg10[%c0_47, %c18_48] : memref<8x326xf32, #tpu.memory_space<vmem>>, vector<8x288xf32>
    %c0_49 = arith.constant 0 : index
    %c25 = arith.constant 25 : index
    %113 = vector.load %arg2[%c0_49, %c25] : memref<8x32xf32, #tpu.memory_space<vmem>>, vector<8x1xf32>
    %114 = vector.broadcast %113 : vector<8x1xf32> to vector<8x288xf32>
    %115 = arith.mulf %112, %114 : vector<8x288xf32>
    %116 = arith.addf %111, %115 : vector<8x288xf32>
    %c0_50 = arith.constant 0 : index
    %c19_51 = arith.constant 19 : index
    %117 = vector.load %arg10[%c0_50, %c19_51] : memref<8x326xf32, #tpu.memory_space<vmem>>, vector<8x288xf32>
    %c0_52 = arith.constant 0 : index
    %c26 = arith.constant 26 : index
    %118 = vector.load %arg2[%c0_52, %c26] : memref<8x32xf32, #tpu.memory_space<vmem>>, vector<8x1xf32>
    %119 = vector.broadcast %118 : vector<8x1xf32> to vector<8x288xf32>
    %120 = arith.mulf %117, %119 : vector<8x288xf32>
    %121 = arith.addf %116, %120 : vector<8x288xf32>
    %c0_53 = arith.constant 0 : index
    %c20_54 = arith.constant 20 : index
    %122 = vector.load %arg10[%c0_53, %c20_54] : memref<8x326xf32, #tpu.memory_space<vmem>>, vector<8x288xf32>
    %c0_55 = arith.constant 0 : index
    %c27 = arith.constant 27 : index
    %123 = vector.load %arg2[%c0_55, %c27] : memref<8x32xf32, #tpu.memory_space<vmem>>, vector<8x1xf32>
    %124 = vector.broadcast %123 : vector<8x1xf32> to vector<8x288xf32>
    %125 = arith.mulf %122, %124 : vector<8x288xf32>
    %126 = arith.addf %121, %125 : vector<8x288xf32>
    %c0_56 = arith.constant 0 : index
    %c36_57 = arith.constant 36 : index
    %127 = vector.load %arg10[%c0_56, %c36_57] : memref<8x326xf32, #tpu.memory_space<vmem>>, vector<8x288xf32>
    %c0_58 = arith.constant 0 : index
    %c28 = arith.constant 28 : index
    %128 = vector.load %arg2[%c0_58, %c28] : memref<8x32xf32, #tpu.memory_space<vmem>>, vector<8x1xf32>
    %129 = vector.broadcast %128 : vector<8x1xf32> to vector<8x288xf32>
    %130 = arith.mulf %127, %129 : vector<8x288xf32>
    %131 = arith.addf %126, %130 : vector<8x288xf32>
    %c0_59 = arith.constant 0 : index
    %c37_60 = arith.constant 37 : index
    %132 = vector.load %arg10[%c0_59, %c37_60] : memref<8x326xf32, #tpu.memory_space<vmem>>, vector<8x288xf32>
    %c0_61 = arith.constant 0 : index
    %c29 = arith.constant 29 : index
    %133 = vector.load %arg2[%c0_61, %c29] : memref<8x32xf32, #tpu.memory_space<vmem>>, vector<8x1xf32>
    %134 = vector.broadcast %133 : vector<8x1xf32> to vector<8x288xf32>
    %135 = arith.mulf %132, %134 : vector<8x288xf32>
    %136 = arith.addf %131, %135 : vector<8x288xf32>
    %c0_62 = arith.constant 0 : index
    %c38 = arith.constant 38 : index
    %137 = vector.load %arg10[%c0_62, %c38] : memref<8x326xf32, #tpu.memory_space<vmem>>, vector<8x288xf32>
    %c0_63 = arith.constant 0 : index
    %c30 = arith.constant 30 : index
    %138 = vector.load %arg2[%c0_63, %c30] : memref<8x32xf32, #tpu.memory_space<vmem>>, vector<8x1xf32>
    %139 = vector.broadcast %138 : vector<8x1xf32> to vector<8x288xf32>
    %140 = arith.mulf %137, %139 : vector<8x288xf32>
    %141 = arith.addf %136, %140 : vector<8x288xf32>
    %c0_64 = arith.constant 0 : index
    %c31 = arith.constant 31 : index
    %142 = vector.load %arg2[%c0_64, %c31] : memref<8x32xf32, #tpu.memory_space<vmem>>, vector<8x1xf32>
    %143 = vector.broadcast %142 : vector<8x1xf32> to vector<8x288xf32>
    %144 = arith.addf %141, %143 : vector<8x288xf32>
    %145 = tpu.concatenate %7, %88, %144 in 0 : vector<8x288xf32>, vector<8x288xf32>, vector<8x288xf32> -> vector<24x288xf32>
    %c0_65 = arith.constant 0 : index
    %c0_66 = arith.constant 0 : index
    %146 = vector.load %arg3[%c0_65, %c0_66] : memref<8x24xf32, #tpu.memory_space<vmem>>, vector<8x24xf32>
    %cst_67 = arith.constant dense<0.000000e+00> : vector<8x288xf32>
    %147 = tpu.matmul %146, %145, %cst_67 {dimension_numbers = #tpu.dot_dimension_numbers<[1], [0], [0], [1], [0, 0, 1, 1], [], []>} : vector<8x24xf32>, vector<24x288xf32>, vector<8x288xf32> -> vector<8x288xf32>
    %c0_68 = arith.constant 0 : index
    %c0_69 = arith.constant 0 : index
    %148 = vector.load %arg4[%c0_68, %c0_69] : memref<8x1xf32, #tpu.memory_space<vmem>>, vector<8x1xf32>
    %149 = vector.broadcast %148 : vector<8x1xf32> to vector<8x288xf32>
    %150 = arith.addf %147, %149 : vector<8x288xf32>
    %cst_70 = arith.constant 0.000000e+00 : f32
    %151 = vector.broadcast %cst_70 : f32 to vector<8x288xf32>
    %152 = arith.cmpf oge, %150, %151 : vector<8x288xf32>
    %cst_71 = arith.constant 1.000000e-01 : f32
    %153 = vector.broadcast %cst_71 : f32 to vector<8x288xf32>
    %154 = arith.mulf %153, %150 : vector<8x288xf32>
    %155 = arith.select %152, %150, %154 : vector<8x288xi1>, vector<8x288xf32>
    %c0_72 = arith.constant 0 : index
    %c0_73 = arith.constant 0 : index
    %156 = vector.load %arg5[%c0_72, %c0_73] : memref<8x8xf32, #tpu.memory_space<vmem>>, vector<8x8xf32>
    %cst_74 = arith.constant dense<0.000000e+00> : vector<8x288xf32>
    %157 = tpu.matmul %156, %155, %cst_74 {dimension_numbers = #tpu.dot_dimension_numbers<[1], [0], [0], [1], [0, 0, 1, 1], [], []>} : vector<8x8xf32>, vector<8x288xf32>, vector<8x288xf32> -> vector<8x288xf32>
    %c0_75 = arith.constant 0 : index
    %c0_76 = arith.constant 0 : index
    %158 = vector.load %arg6[%c0_75, %c0_76] : memref<8x1xf32, #tpu.memory_space<vmem>>, vector<8x1xf32>
    %159 = vector.broadcast %158 : vector<8x1xf32> to vector<8x288xf32>
    %160 = arith.addf %157, %159 : vector<8x288xf32>
    %c0_77 = arith.constant 0 : index
    %161 = memref.load %arg8[%c0_77] : memref<1xf32, #tpu.memory_space<smem>>
    %162 = vector.broadcast %161 : f32 to vector<8x288xf32>
    %163 = arith.mulf %160, %162 : vector<8x288xf32>
    %c0_78 = arith.constant 0 : index
    %c0_79 = arith.constant 0 : index
    %164 = vector.load %arg9[%c0_78, %c0_79] : memref<8x288xf32, #tpu.memory_space<vmem>>, vector<8x288xf32>
    tpu.vector_store %arg9[%c0_78, %c0_79], %163 {strides = array<i32>} : memref<8x288xf32, #tpu.memory_space<vmem>>, vector<8x288xf32>,
    return
  }
  func.func @transform_0(%arg0: i32) -> (i32, i32) {
    %c0_i32 = arith.constant 0 : i32
    %c0_i32_0 = arith.constant 0 : i32
    return %arg0, %c0_i32 : i32, i32
  }
  func.func @transform_1(%arg0: i32) -> (i32, i32) {
    %c0_i32 = arith.constant 0 : i32
    %c0_i32_0 = arith.constant 0 : i32
    %c0_i32_1 = arith.constant 0 : i32
    return %c0_i32, %c0_i32_0 : i32, i32
  }
  func.func @transform_2(%arg0: i32) -> (i32, i32) {
    %c0_i32 = arith.constant 0 : i32
    %c0_i32_0 = arith.constant 0 : i32
    %c0_i32_1 = arith.constant 0 : i32
    return %c0_i32, %c0_i32_0 : i32, i32
  }
  func.func @transform_3(%arg0: i32) -> (i32, i32) {
    %c0_i32 = arith.constant 0 : i32
    %c0_i32_0 = arith.constant 0 : i32
    %c0_i32_1 = arith.constant 0 : i32
    return %c0_i32, %c0_i32_0 : i32, i32
  }
  func.func @transform_4(%arg0: i32) -> (i32, i32) {
    %c0_i32 = arith.constant 0 : i32
    %c0_i32_0 = arith.constant 0 : i32
    %c0_i32_1 = arith.constant 0 : i32
    return %c0_i32, %c0_i32_0 : i32, i32
  }
  func.func @transform_5(%arg0: i32) -> (i32, i32) {
    %c0_i32 = arith.constant 0 : i32
    %c0_i32_0 = arith.constant 0 : i32
    %c0_i32_1 = arith.constant 0 : i32
    return %c0_i32, %c0_i32_0 : i32, i32
  }
  func.func @transform_6(%arg0: i32) -> (i32, i32) {
    %c0_i32 = arith.constant 0 : i32
    %c0_i32_0 = arith.constant 0 : i32
    %c0_i32_1 = arith.constant 0 : i32
    return %c0_i32, %c0_i32_0 : i32, i32
  }
  func.func @transform_7(%arg0: i32) -> i32 {
    %c0_i32 = arith.constant 0 : i32
    %c0_i32_0 = arith.constant 0 : i32
    return %c0_i32 : i32
  }
  func.func @transform_8(%arg0: i32) -> (i32, i32) {
    %c0_i32 = arith.constant 0 : i32
    %c0_i32_0 = arith.constant 0 : i32
    return %arg0, %c0_i32 : i32, i32
  }
}

</mosaic_0001>

<bundles_post_ra>
// kernel: tpu_custom_call.1
= control target key start
LH: loop header
LB: loop body
LE: loop exit
PB: predicated region body
PF: predicated region fallthrough
CT: control target
= control target key end

     0   :  { %14 = vsyncpa [#allocation5], 0  ;;  %s1680_s0 = inlined_call_operand.hbm [shape: f32[8,396], index: 0, kind: input, shape index: {}]   ;;  %s1681_s1 = inlined_call_operand.vmem [shape: f32[8,32], index: 1, kind: input, shape index: {}]   ;;  %s1682_s2 = inlined_call_operand.vmem [shape: f32[8,24], index: 2, kind: input, shape index: {}]   ;;  %s1683_s3 = inlined_call_operand.vmem [shape: f32[8,1], index: 3, kind: input, shape index: {}]   ;;  %s1684_s4 = inlined_call_operand.hbm [shape: f32[8,8], index: 4, kind: input, shape index: {}]   ;;  %s1685_s5 = inlined_call_operand.vmem [shape: f32[8,1], index: 5, kind: input, shape index: {}]   ;;  %s1686_s6 = inlined_call_operand.vmem [shape: f32[1,288], index: 6, kind: input, shape index: {}]   ;;  %s1687_s7 = inlined_call_operand.<no memory space> [shape: f32[1], index: 7, kind: input, shape index: {}]   ;;  %s1688_s8 = inlined_call_operand.hbm [shape: f32[8,288], index: 8, kind: output, shape index: {}]  }
   0x1   :  { %15 = vsyncpa [#allocation8], 0 }
   0x2   :  { %16 = vsyncpa [#allocation6], 0  ;;  %s22_s29 = sshll.u32 %s1680_s0, 4  ;;  %s1190_s30 = smov [#allocation4]   ;;  %s23_s29 = int_to_ptr.hbm [resolvable:$true] %s22_s29 }
   0x3   :  { %s24_s9 = sshll.u32 %s1190_s30, 4  ;;  %s39_s12 = sshll.u32 %s1684_s4, 4  ;;  %s25_s9 = int_to_ptr.vmem [resolvable:$true] %s24_s9  ;;  %s40_s12 = int_to_ptr.hbm [resolvable:$true] %s39_s12 }
   0x4   :  { %27 = dma.hbm_to_vmem [thread:$0]  %s23_s29, 512, %s25_s9, [#allocation5]  }
   0x5   :  { %s1191_s13 = smov [#allocation7]  }
   0x6   :  { %s41_s14 = sshll.u32 %s1191_s13, 4  ;;  %s42_s14 = int_to_ptr.vmem [resolvable:$true] %s41_s14 }
   0x7   :  { %44 = dma.hbm_to_vmem [thread:$0]  %s40_s12, 128, %s42_s14, [#allocation8]  }
   0x8   :  { %1184 = dma.done.wait [#allocation5], 512  }
   0x9   :  { %1185 = vsyncadd [#allocation5], 4294966784 }
   0xa   :  { %1186 = dma.done.wait [#allocation8], 128  }
   0xb   :  { %1187 = vsyncadd [#allocation8], 4294967168  ;;  %v1192_v0 = vmov 13   ;;  %v1193_v1 = vmov 15   ;;  %v1194_v2 = vmov 17   ;;  %v1293_v3 = vld [vmem:[%s1681_s1] sm:$0xff] }
   0xc   :  { %1046 = vset.pattern.permute.xlu0 %v1192_v0  ;;  %1048 = vset.pattern.permute.xlu1 %v1193_v1  ;;  %v1195_v4 = vmov 14   ;;  %v1196_v5 = vmov 16   ;;  %v1197_v6 = vmov 18   ;;  %v1198_v7 = vmov 19   ;;  %v59_v10 = vld [vmem:[%s1686_s6] sm:$0x7] }
   0xd   :  { %1050 = vset.pattern.permute.xlu2 %v1194_v2  ;;  %101 = vperm.xlu0 %1046, %v1293_v3   ;;  %v1199_v8 = vmov 12   ;;  %v1200_v9 = vmov 20   ;;  %v501_v11 = vperm.slane %v59_v10, 1  ;;  %v500_v12 = vperm.slane %v59_v10, 0  ;;  %s1201_s17 = smov 35   ;;  %v1313_v20 = vld [vmem:[#allocation4] sm:$0xff] }
   0xe   :  { %199 = vperm.xlu1 %1048, %v1293_v3   ;;  %297 = vperm.xlu2 %1050, %v1293_v3   ;;  %v1202_v13 = vmov 3   ;;  %v1203_v14 = vmov 21   ;;  %v502_v15 = vperm.slane %v59_v10, 2  ;;  %v1204_v16 = vmov 24   ;;  %v1315_v21 = vld [vmem:[#allocation4 + $0x8] sm:$0xff]  ;;  %s1208_s6 = smov 127  }
   0xf   :  { %v1205_v17 = vmov 4   ;;  %v1206_v18 = vmov 25   ;;  %v1207_v19 = vmov 23   ;;  %v1321_v25 = vld [vmem:[#allocation4 + $0x10] sm:$0xff]  ;;  %s1209_s18 = smov 126   ;;  %s1210_s19 = smov 110  }
  0x10   :  { %s1211_s20 = smov 109   ;;  %v1212_v40 = vmov 26   ;;  %v1213_v41 = vmov 6   ;;  %v1214_v46 = vmov 5   ;;  %s1215_s21 = smov 108   ;;  %vm509_vm0 = vcmask 285696  }
  0x11   :  { %s1216_s22 = smov 92   ;;  %s1217_s23 = smov 91   ;;  %v1219_v62 = vmov 7   ;;  %v1220_v63 = vmov 28   ;;  %v1221_v0 = vmov 27   ;;  %v1222_v1 = vmov 29  }
  0x12   :  { %s1218_s24 = smov 90   ;;  %v1223_v2 = vmov 10   ;;  %vm116_vm1 = vcmask 1039360   ;;  %vm165_vm2 = vcmask 1031168   ;;  %vm214_vm3 = vcmask 900096   ;;  %s1229_s25 = smov 112  }
  0x13   :  { %vm263_vm4 = vcmask 891904   ;;  %vm312_vm5 = vcmask 883712   ;;  %vm361_vm6 = vcmask 752640   ;;  %vm410_vm7 = vcmask 744448   ;;  %s1235_s28 = smov 54   ;;  %s1236_s29 = smov 19  }
  0x14   :  { %vm459_vm8 = vcmask 736256   ;;  %vm520_vm9 = vcmask 572824   ;;  %vm518_vm10 = vcmask 154624   ;;  %vm540_vm11 = vcmask 416768   ;;  %s1238_s13 = smov [#allocation9]   ;;  %s980_s4 = sshll.u32 %s1688_s8, 4  ;;  %s981_s4 = int_to_ptr.hbm [resolvable:$true] %s980_s4 }
  0x15   :  { %1047 = vset.pattern.permute.xlu0 %v1195_v4  ;;  %vm531_vm12 = vcmask 916480   ;;  %vm537_vm13 = vcmask 1047704   ;;  %vm773_vm14 = vcmask 441344   ;;  %vm804_vm15 = vcmask 605184   ;;  %s978_s14 = sshll.u32 %s1238_s13, 4  ;;  %s979_s14 = int_to_ptr.vmem [resolvable:$true] %s978_s14 }
  0x16   :  { %1049 = vset.pattern.permute.xlu1 %v1196_v5  ;;  %150 = vperm.xlu0 %1047, %v1293_v3  }
  0x17   :  { %248 = vperm.xlu1 %1049, %v1293_v3   ;;  %1051 = vset.pattern.permute.xlu2 %v1197_v6  ;;  %v1224_v6 = vmov 8  }
  0x18   :  { %346 = vperm.xlu2 %1051, %v1293_v3  }
  0x1e   :  { %1054 = vset.pattern.permute.xlu0 %v1199_v8  ;;  %v1226_v8 = vmov 2  }
  0x1f   :  { %1052 = vset.pattern.permute.xlu1 %v1198_v7  ;;  %87 = vperm.xlu0 %1054, %v1293_v3   ;;  %v1225_v7 = vmov 30  }
  0x20   :  { %395 = vperm.xlu1 %1052, %v1293_v3   ;;  %1053 = vset.pattern.permute.xlu2 %v1200_v9 }
  0x21   :  { %444 = vperm.xlu2 %1053, %v1293_v3  }
  0x27   :  { %503 = vrot.lane.b32.xlu0 %v500_v12, %s1201_s17 }
  0x28   :  { %505 = vrot.lane.b32.xlu1 %v501_v11, %s1201_s17  ;;  %1056 = vset.pattern.permute.xlu0 %v1207_v19 }
  0x29   :  { %1057 = vset.pattern.permute.xlu1 %v1202_v13  ;;  %1055 = vset.pattern.permute.xlu2 %v1203_v14  ;;  %v1227_v14 = vmov 9  }
  0x2a   :  { %493 = vperm.xlu2 %1055, %v1293_v3  }
  0x2f   :  { %555 = vperm.xlu0 %1056, %v1293_v3  }
  0x30   :  { %94 = vperm.xlu1 %1057, %v1293_v3  }
  0x32   :  { %507 = vrot.lane.b32.xlu2 %v502_v15, %s1201_s17 }
  0x33   :  { %1058 = vset.pattern.permute.xlu2 %v1204_v16 }
  0x37   :  { %1061 = vset.pattern.permute.xlu0 %v1214_v46 }
  0x38   :  { %1059 = vset.pattern.permute.xlu1 %v1205_v17 }
  0x39   :  { %143 = vperm.xlu1 %1059, %v1293_v3  }
  0x3a   :  { %579 = vperm.xlu2 %1058, %v1293_v3  }
  0x41   :  { %1062 = vset.pattern.permute.xlu1 %v1212_v40 }
  0x42   :  { %1060 = vset.pattern.permute.xlu2 %v1206_v18  ;;  %v1228_v18 = vmov 22  }
  0x43   :  { %603 = vperm.xlu2 %1060, %v1293_v3  }
  0x4b   :  { %1063 = vset.pattern.permute.xlu2 %v1213_v41 }
  0x68   :  { %v298_v31 = vpop.permute.xlu2 %297 }
  0x69   :  { %v300_v42 = vmul.f32 %v298_v31, %v1313_v20  ;;  %v301_v43 = vmul.f32 %v298_v31, %v1315_v21  ;;  %v302_v49 = vmul.f32 %v298_v31, %v1321_v25 }
  0x72   :  { %v347_v38 = vpop.permute.xlu2 %346 }
  0x73   :  { %v349_v47 = vmul.f32 %v347_v38, %v1313_v20  ;;  %v350_v48 = vmul.f32 %v347_v38, %v1315_v21  ;;  %v351_v54 = vmul.f32 %v347_v38, %v1321_v25 }
  0x7b   :  { %v445_v44 = vpop.permute.xlu2 %444 }
  0x7c   :  { %v447_v58 = vmul.f32 %v445_v44, %v1313_v20  ;;  %v448_v59 = vmul.f32 %v445_v44, %v1315_v21  ;;  %v449_v61 = vmul.f32 %v445_v44, %v1321_v25 }
  0x7f   :  { %v102_v22 = vpop.permute.xlu0 %101 }
  0x80   :  { %v104_v23 = vmul.f32 %v102_v22, %v1313_v20  ;;  %v105_v24 = vmul.f32 %v102_v22, %v1315_v21  ;;  %v106_v26 = vmul.f32 %v102_v22, %v1321_v25  ;;  %v200_v30 = vpop.permute.xlu1 %199 }
  0x81   :  { %v202_v32 = vmul.f32 %v200_v30, %v1313_v20  ;;  %v203_v33 = vmul.f32 %v200_v30, %v1315_v21  ;;  %v204_v39 = vmul.f32 %v200_v30, %v1321_v25 }
  0x82   :  { %130 = vrot.lane.b32.xlu2 %v105_v24, %s1208_s6  ;;  %128 = vrot.lane.b32.xlu1 %v104_v23, %s1208_s6 }
  0x84   :  { %v1350_v50 = vpop.permute.xlu2 %493 }
  0x88   :  { %v151_v27 = vpop.permute.xlu0 %150 }
  0x89   :  { %v153_v28 = vmul.f32 %v151_v27, %v1313_v20  ;;  %v154_v29 = vmul.f32 %v151_v27, %v1315_v21  ;;  %v155_v34 = vmul.f32 %v151_v27, %v1321_v25  ;;  %v249_v35 = vpop.permute.xlu1 %248 }
  0x8a   :  { %132 = vrot.lane.b32.xlu1 %v106_v26, %s1208_s6  ;;  %v251_v36 = vmul.f32 %v249_v35, %v1313_v20  ;;  %v252_v37 = vmul.f32 %v249_v35, %v1315_v21  ;;  %v253_v45 = vmul.f32 %v249_v35, %v1321_v25 }
  0x8b   :  { %177 = vrot.lane.b32.xlu2 %v153_v28, %s1209_s18  ;;  %179 = vrot.lane.b32.xlu0 %v154_v29, %s1209_s18 }
  0x8c   :  { %v508_v55 = vpop.permute.xlu2 %507 }
  0x91   :  { %v88_v11 = vpop.permute.xlu0 %87 }
  0x92   :  { %181 = vrot.lane.b32.xlu1 %v155_v34, %s1209_s18  ;;  %v396_v51 = vpop.permute.xlu1 %395  ;;  %v90_v24 = vmul.f32 %v88_v11, %v1313_v20  ;;  %v92_v29 = vmul.f32 %v88_v11, %v1321_v25  ;;  %v91_v31 = vmul.f32 %v88_v11, %v1315_v21 }
  0x93   :  { %226 = vrot.lane.b32.xlu2 %v202_v32, %s1210_s19  ;;  %228 = vrot.lane.b32.xlu0 %v203_v33, %s1210_s19  ;;  %v398_v52 = vmul.f32 %v396_v51, %v1313_v20  ;;  %v399_v53 = vmul.f32 %v396_v51, %v1315_v21  ;;  %v400_v60 = vmul.f32 %v396_v51, %v1321_v25 }
  0x94   :  { %v1381_v4 = vpop.permute.xlu2 %579 }
  0x99   :  { %v1396_v17 = vpop.permute.xlu0 %503 }
  0x9a   :  { %230 = vrot.lane.b32.xlu1 %v204_v39, %s1210_s19  ;;  %v1361_v56 = vpop.permute.xlu1 %505 }
  0x9b   :  { %275 = vrot.lane.b32.xlu2 %v251_v36, %s1211_s20  ;;  %277 = vrot.lane.b32.xlu0 %v252_v37, %s1211_s20  ;;  %v1365_v57 = vsel %vm509_vm0, %v1361_v56, %v508_v55 }
  0x9d   :  { %v1388_v9 = vpop.permute.xlu2 %603 }
  0xa1   :  { %v1401_v23 = vpop.permute.xlu0 %555 }
  0xa2   :  { %279 = vrot.lane.b32.xlu1 %v253_v45, %s1211_s20  ;;  %v95_v5 = vpop.permute.xlu1 %94 }
  0xa3   :  { %324 = vrot.lane.b32.xlu2 %v300_v42, %s1215_s21  ;;  %326 = vrot.lane.b32.xlu0 %v301_v43, %s1215_s21  ;;  %v98_v12 = vmul.f32 %v95_v5, %v1315_v21  ;;  %v97_v19 = vmul.f32 %v95_v5, %v1313_v20  ;;  %v99_v30 = vmul.f32 %v95_v5, %v1321_v25 }
  0xaa   :  { %328 = vrot.lane.b32.xlu1 %v302_v49, %s1215_s21 }
  0xab   :  { %373 = vrot.lane.b32.xlu2 %v349_v47, %s1216_s22  ;;  %375 = vrot.lane.b32.xlu0 %v350_v48, %s1216_s22  ;;  %v144_v10 = vpop.permute.xlu1 %143 }
  0xac   :  { %v147_v13 = vmul.f32 %v144_v10, %v1315_v21  ;;  %v146_v16 = vmul.f32 %v144_v10, %v1313_v20  ;;  %v148_v40 = vmul.f32 %v144_v10, %v1321_v25 }
  0xb2   :  { %377 = vrot.lane.b32.xlu1 %v351_v54, %s1216_s22 }
  0xb3   :  { %422 = vrot.lane.b32.xlu2 %v398_v52, %s1217_s23  ;;  %424 = vrot.lane.b32.xlu0 %v399_v53, %s1217_s23 }
  0xba   :  { %426 = vrot.lane.b32.xlu1 %v400_v60, %s1217_s23 }
  0xbb   :  { %471 = vrot.lane.b32.xlu2 %v447_v58, %s1218_s24  ;;  %473 = vrot.lane.b32.xlu0 %v448_v59, %s1218_s24 }
  0xc2   :  { %627 = vperm.xlu1 %1062, %v1293_v3  }
  0xc3   :  { %241 = vperm.xlu2 %1063, %v1293_v3   ;;  %192 = vperm.xlu0 %1061, %v1293_v3  }
  0xca   :  { %475 = vrot.lane.b32.xlu1 %v449_v61, %s1218_s24 }
  0xcb   :  { %1065 = vset.pattern.permute.xlu2 %v1219_v62  ;;  %1066 = vset.pattern.permute.xlu0 %v1220_v63 }
  0xcc   :  { %290 = vperm.xlu2 %1065, %v1293_v3   ;;  %675 = vperm.xlu0 %1066, %v1293_v3  }
  0xcd   :  { %1064 = vset.pattern.permute.xlu1 %v1221_v0 }
  0xd2   :  { %651 = vperm.xlu1 %1064, %v1293_v3  }
  0xd4   :  { %1068 = vset.pattern.permute.xlu2 %v1222_v1  ;;  %1071 = vset.pattern.permute.xlu0 %v1223_v2 }
  0xd5   :  { %699 = vperm.xlu2 %1068, %v1293_v3   ;;  %437 = vperm.xlu0 %1071, %v1293_v3  }
  0xda   :  { %1067 = vset.pattern.permute.xlu1 %v1224_v6 }
  0xdb   :  { %339 = vperm.xlu1 %1067, %v1293_v3  }
  0xdc   :  { %v131_v15 = vpop.permute.xlu2 %130 }
  0xdd   :  { %1070 = vset.pattern.permute.xlu2 %v1225_v7  ;;  %1073 = vset.pattern.permute.xlu0 %v1226_v8 }
  0xde   :  { %723 = vperm.xlu2 %1070, %v1293_v3   ;;  %80 = vperm.xlu0 %1073, %v1293_v3  }
  0xe3   :  { %1069 = vset.pattern.permute.xlu1 %v1227_v14 }
  0xe4   :  { %388 = vperm.xlu1 %1069, %v1293_v3  }
  0xe5   :  { %v178_v22 = vpop.permute.xlu2 %177 }
  0xe6   :  { %112 = vrot.lane.b32.xlu2 %v98_v12, %s1208_s6  ;;  %161 = vrot.lane.b32.xlu0 %v147_v13, %s1209_s18 }
  0xec   :  { %1072 = vset.pattern.permute.xlu1 %v1228_v18 }
  0xed   :  { %548 = vperm.xlu1 %1072, %v1293_v3   ;;  %v227_v33 = vpop.permute.xlu2 %226 }
  0xee   :  { %159 = vrot.lane.b32.xlu2 %v146_v16, %s1209_s18 }
  0xf4   :  { %v129_v26 = vpop.permute.xlu1 %128 }
  0xf5   :  { %v134_v27 = vsel %vm116_vm1, %v129_v26, %v131_v15  ;;  %110 = vrot.lane.b32.xlu1 %v97_v19, %s1208_s6  ;;  %v276_v47 = vpop.permute.xlu2 %275 }
  0xf6   :  { %v139_v28 = vadd.f32 %v134_v27, %v90_v24 }
  0xfc   :  { %v133_v32 = vpop.permute.xlu1 %132 }
  0xfd   :  { %v135_v34 = vsel %vm116_vm1, %v131_v15, %v133_v32  ;;  %v141_v35 = vadd.f32 %v133_v32, %v92_v29  ;;  %114 = vrot.lane.b32.xlu1 %v99_v30, %s1208_s6  ;;  %v180_v36 = vpop.permute.xlu0 %179  ;;  %v1420_v59 = vpop.permute.xlu2 %324 }
  0xfe   :  { %v140_v37 = vadd.f32 %v135_v34, %v91_v31  ;;  %v183_v38 = vsel %vm165_vm2, %v178_v22, %v180_v36 }
  0xff   :  { %v188_v39 = vadd.f32 %v183_v38, %v139_v28 }
 0x104   :  { %v182_v41 = vpop.permute.xlu1 %181 }
 0x105   :  { %v184_v42 = vsel %vm165_vm2, %v180_v36, %v182_v41  ;;  %v190_v43 = vadd.f32 %v182_v41, %v141_v35  ;;  %163 = vrot.lane.b32.xlu1 %v148_v40, %s1209_s18  ;;  %v229_v44 = vpop.permute.xlu0 %228  ;;  %v1423_v0 = vpop.permute.xlu2 %373 }
 0x106   :  { %v189_v45 = vadd.f32 %v184_v42, %v140_v37  ;;  %v232_v46 = vsel %vm214_vm3, %v227_v33, %v229_v44  ;;  %v510_v42 = vsel %vm509_vm0, %v1396_v17, %v1361_v56  ;;  %vm820_vm0 = vcmask 195584  }
 0x107   :  { %v237_v48 = vadd.f32 %v232_v46, %v188_v39 }
 0x10c   :  { %v231_v49 = vpop.permute.xlu1 %230 }
 0x10d   :  { %v233_v51 = vsel %vm214_vm3, %v229_v44, %v231_v49  ;;  %v239_v52 = vadd.f32 %v231_v49, %v190_v43  ;;  %v278_v53 = vpop.permute.xlu0 %277  ;;  %v1425_v6 = vpop.permute.xlu2 %422 }
 0x10e   :  { %v238_v54 = vadd.f32 %v233_v51, %v189_v45  ;;  %v281_v55 = vsel %vm263_vm4, %v276_v47, %v278_v53 }
 0x10f   :  { %v1418_v58 = vadd.f32 %v281_v55, %v237_v48 }
 0x114   :  { %v280_v60 = vpop.permute.xlu1 %279 }
 0x115   :  { %v282_v61 = vsel %vm263_vm4, %v278_v53, %v280_v60  ;;  %v327_v62 = vpop.permute.xlu0 %326  ;;  %v1431_v11 = vpop.permute.xlu2 %471  ;;  %v288_v13 = vadd.f32 %v280_v60, %v239_v52 }
 0x116   :  { %v287_v63 = vadd.f32 %v282_v61, %v238_v54  ;;  %v330_v52 = vsel %vm312_vm5, %v1420_v59, %v327_v62 }
 0x117   :  { %v335_v61 = vadd.f32 %v330_v52, %v1418_v58 }
 0x11c   :  { %v329_v1 = vpop.permute.xlu1 %328 }
 0x11d   :  { %v376_v2 = vpop.permute.xlu0 %375  ;;  %v331_v14 = vsel %vm312_vm5, %v327_v62, %v329_v1  ;;  %v337_v22 = vadd.f32 %v329_v1, %v288_v13  ;;  %v242_v24 = vpop.permute.xlu2 %241 }
 0x11e   :  { %v336_v27 = vadd.f32 %v331_v14, %v287_v63  ;;  %v245_v32 = vmul.f32 %v242_v24, %v1315_v21  ;;  %v246_v33 = vmul.f32 %v242_v24, %v1321_v25  ;;  %v244_v36 = vmul.f32 %v242_v24, %v1313_v20 }
 0x11f   :  { %v379_v60 = vsel %vm361_vm6, %v1423_v0, %v376_v2 }
 0x120   :  { %v384_v62 = vadd.f32 %v379_v60, %v335_v61 }
 0x124   :  { %v378_v5 = vpop.permute.xlu1 %377 }
 0x125   :  { %v1427_v7 = vpop.permute.xlu0 %424  ;;  %v380_v26 = vsel %vm361_vm6, %v376_v2, %v378_v5  ;;  %v386_v28 = vadd.f32 %v378_v5, %v337_v22 }
 0x126   :  { %v385_v30 = vadd.f32 %v380_v26, %v336_v27  ;;  %v291_v43 = vpop.permute.xlu2 %290  ;;  %v428_v59 = vsel %vm410_vm7, %v1425_v6, %v1427_v7 }
 0x127   :  { %v294_v46 = vmul.f32 %v291_v43, %v1315_v21  ;;  %v295_v47 = vmul.f32 %v291_v43, %v1321_v25  ;;  %v293_v49 = vmul.f32 %v291_v43, %v1313_v20  ;;  %v433_v0 = vadd.f32 %v428_v59, %v384_v62 }
 0x12c   :  { %v427_v8 = vpop.permute.xlu1 %426 }
 0x12d   :  { %v1429_v10 = vpop.permute.xlu0 %473  ;;  %v429_v29 = vsel %vm410_vm7, %v1427_v7, %v427_v8  ;;  %v435_v31 = vadd.f32 %v427_v8, %v386_v28 }
 0x12e   :  { %v434_v34 = vadd.f32 %v429_v29, %v385_v30  ;;  %v477_v1 = vsel %vm459_vm8, %v1431_v11, %v1429_v10 }
 0x12f   :  { %v1469_v56 = vpop.permute.xlu2 %699  ;;  %v482_v8 = vadd.f32 %v477_v1, %v433_v0 }
 0x131   :  { %v496_v6 = vadd.f32 %v1350_v50, %v482_v8 }
 0x134   :  { %v1433_v12 = vpop.permute.xlu1 %627 }
 0x135   :  { %v193_v15 = vpop.permute.xlu0 %192 }
 0x136   :  { %v195_v16 = vmul.f32 %v193_v15, %v1313_v20  ;;  %v196_v18 = vmul.f32 %v193_v15, %v1315_v21  ;;  %v197_v19 = vmul.f32 %v193_v15, %v1321_v25  ;;  %v515_v15 = vmul.f32 %v1396_v17, %v496_v6 }
 0x138   :  { %212 = vrot.lane.b32.xlu1 %v197_v19, %s1210_s19  ;;  %210 = vrot.lane.b32.xlu0 %v196_v18, %s1210_s19  ;;  %v1490_v2 = vpop.permute.xlu2 %723 }
 0x139   :  { %208 = vrot.lane.b32.xlu2 %v195_v16, %s1210_s19 }
 0x13c   :  { %v476_v35 = vpop.permute.xlu1 %475 }
 0x13d   :  { %v478_v37 = vsel %vm459_vm8, %v1429_v10, %v476_v35  ;;  %v484_v38 = vadd.f32 %v476_v35, %v435_v31 }
 0x13e   :  { %v483_v39 = vadd.f32 %v478_v37, %v434_v34  ;;  %v1466_v51 = vpop.permute.xlu0 %675 }
 0x13f   :  { %v498_v40 = vadd.f32 %v1350_v50, %v484_v38 }
 0x140   :  { %v497_v41 = vadd.f32 %v1350_v50, %v483_v39  ;;  %261 = vrot.lane.b32.xlu1 %v246_v33, %s1211_s20  ;;  %259 = vrot.lane.b32.xlu0 %v245_v32, %s1211_s20  ;;  %v113_v10 = vpop.permute.xlu2 %112 }
 0x141   :  { %257 = vrot.lane.b32.xlu2 %v244_v36, %s1211_s20  ;;  %v517_v44 = vmul.f32 %v1365_v57, %v498_v40  ;;  %v1230_v40 = vmov 0.0  }
 0x142   :  { %v516_v45 = vmul.f32 %v510_v42, %v497_v41  ;;  %521 = vst.msk [vmem:[#allocation2 + $0x10] sm:$0xff] %vm520_vm9, %v1230_v40 }
 0x143   :  { %519 = vst.msk [vmem:[#allocation2] sm:$0xff] %vm518_vm10, %v1230_v40 }
 0x144   :  { %v1461_v48 = vpop.permute.xlu1 %651 }
 0x147   :  { %v1485_v63 = vpop.permute.xlu0 %437 }
 0x148   :  { %310 = vrot.lane.b32.xlu1 %v295_v47, %s1215_s21  ;;  %308 = vrot.lane.b32.xlu0 %v294_v46, %s1215_s21  ;;  %v441_v16 = vmul.f32 %v1485_v63, %v1315_v21  ;;  %v160_v50 = vpop.permute.xlu2 %159 }
 0x149   :  { %306 = vrot.lane.b32.xlu2 %v293_v49, %s1215_s21 }
 0x14d   :  { %v340_v57 = vpop.permute.xlu1 %339 }
 0x14e   :  { %v342_v53 = vmul.f32 %v340_v57, %v1313_v20  ;;  %v343_v54 = vmul.f32 %v340_v57, %v1315_v21  ;;  %v344_v55 = vmul.f32 %v340_v57, %v1321_v25 }
 0x150   :  { %359 = vrot.lane.b32.xlu1 %v344_v55, %s1216_s22  ;;  %357 = vrot.lane.b32.xlu0 %v343_v54, %s1216_s22  ;;  %v81_v7 = vpop.permute.xlu0 %80 }
 0x151   :  { %355 = vrot.lane.b32.xlu2 %v342_v53, %s1216_s22  ;;  %v83_v18 = vmul.f32 %v81_v7, %v1313_v20  ;;  %v85_v28 = vmul.f32 %v81_v7, %v1321_v25  ;;  %v84_v29 = vmul.f32 %v81_v7, %v1315_v21 }
 0x156   :  { %v389_v5 = vpop.permute.xlu1 %388 }
 0x157   :  { %v391_v58 = vmul.f32 %v389_v5, %v1313_v20  ;;  %v392_v13 = vmul.f32 %v389_v5, %v1315_v21  ;;  %v393_v14 = vmul.f32 %v389_v5, %v1321_v25 }
 0x158   :  { %v162_v19 = vpop.permute.xlu0 %161 }
 0x159   :  { %408 = vrot.lane.b32.xlu1 %v393_v14, %s1217_s23  ;;  %406 = vrot.lane.b32.xlu0 %v392_v13, %s1217_s23  ;;  %v166_v27 = vsel %vm165_vm2, %v160_v50, %v162_v19 }
 0x15a   :  { %404 = vrot.lane.b32.xlu2 %v391_v58, %s1217_s23 }
 0x15f   :  { %v1499_v11 = vpop.permute.xlu1 %548 }
 0x161   :  { %527 = vrot.lane.b32.xlu1 %v516_v45, %s1229_s25  ;;  %525 = vrot.lane.b32.xlu0 %v515_v15, %s1229_s25 }
 0x162   :  { %529 = vrot.lane.b32.xlu2 %v517_v44, %s1229_s25 }
 0x167   :  { %v111_v22 = vpop.permute.xlu1 %110 }
 0x168   :  { %v117_v24 = vsel %vm116_vm1, %v111_v22, %v113_v10 }
 0x169   :  { %v122_v26 = vadd.f32 %v117_v24, %v83_v18  ;;  %455 = vrot.lane.b32.xlu0 %v441_v16, %s1218_s24 }
 0x16b   :  { %v171_v17 = vadd.f32 %v166_v27, %v122_v26 }
 0x16f   :  { %v115_v30 = vpop.permute.xlu1 %114 }
 0x170   :  { %v118_v31 = vsel %vm116_vm1, %v113_v10, %v115_v30  ;;  %v124_v32 = vadd.f32 %v115_v30, %v85_v28 }
 0x171   :  { %v123_v33 = vadd.f32 %v118_v31, %v84_v29 }
 0x177   :  { %v164_v34 = vpop.permute.xlu1 %163 }
 0x178   :  { %v167_v35 = vsel %vm165_vm2, %v162_v19, %v164_v34  ;;  %v173_v36 = vadd.f32 %v164_v34, %v124_v32 }
 0x179   :  { %v172_v37 = vadd.f32 %v167_v35, %v123_v33 }
 0x193   :  { %v209_v38 = vpop.permute.xlu2 %208 }
 0x19b   :  { %v258_v39 = vpop.permute.xlu2 %257 }
 0x1a3   :  { %v307_v41 = vpop.permute.xlu2 %306 }
 0x1aa   :  { %v213_v42 = vpop.permute.xlu1 %212  ;;  %v211_v43 = vpop.permute.xlu0 %210 }
 0x1ab   :  { %v222_v44 = vadd.f32 %v213_v42, %v173_v36  ;;  %v356_v45 = vpop.permute.xlu2 %355  ;;  %v215_v46 = vsel %vm214_vm3, %v209_v38, %v211_v43  ;;  %v216_v47 = vsel %vm214_vm3, %v211_v43, %v213_v42 }
 0x1ac   :  { %v220_v49 = vadd.f32 %v215_v46, %v171_v17  ;;  %v221_v57 = vadd.f32 %v216_v47, %v172_v37  ;;  %v440_v46 = vmul.f32 %v1485_v63, %v1313_v20 }
 0x1b2   :  { %v262_v52 = vpop.permute.xlu1 %261  ;;  %v260_v53 = vpop.permute.xlu0 %259 }
 0x1b3   :  { %v271_v54 = vadd.f32 %v262_v52, %v222_v44  ;;  %v264_v55 = vsel %vm263_vm4, %v258_v39, %v260_v53  ;;  %v265_v60 = vsel %vm263_vm4, %v260_v53, %v262_v52  ;;  %v1231_v52 = vmov 11  }
 0x1b4   :  { %v269_v61 = vadd.f32 %v264_v55, %v220_v49  ;;  %v270_v59 = vadd.f32 %v265_v60, %v221_v57  ;;  %v405_v62 = vpop.permute.xlu2 %404  ;;  %1075 = vset.pattern.permute.xlu0 %v1231_v52 }
 0x1ba   :  { %v311_v1 = vpop.permute.xlu1 %310  ;;  %v309_v0 = vpop.permute.xlu0 %308 }
 0x1bb   :  { %v320_v5 = vadd.f32 %v311_v1, %v271_v54  ;;  %v313_v8 = vsel %vm312_vm5, %v307_v41, %v309_v0  ;;  %v314_v58 = vsel %vm312_vm5, %v309_v0, %v311_v1 }
 0x1bc   :  { %v318_v13 = vadd.f32 %v313_v8, %v269_v61  ;;  %v319_v14 = vadd.f32 %v314_v58, %v270_v59  ;;  %v530_v6 = vpop.permute.xlu2 %529  ;;  %v442_v61 = vmul.f32 %v1485_v63, %v1321_v25 }
 0x1bd   :  { %541 = vst.msk [vmem:[#allocation2 + $0x10] sm:$0xff] %vm540_vm11, %v530_v6 }
 0x1c2   :  { %v360_v7 = vpop.permute.xlu1 %359  ;;  %v358_v10 = vpop.permute.xlu0 %357 }
 0x1c3   :  { %v369_v15 = vadd.f32 %v360_v7, %v320_v5  ;;  %v362_v16 = vsel %vm361_vm6, %v356_v45, %v358_v10  ;;  %v363_v18 = vsel %vm361_vm6, %v358_v10, %v360_v7 }
 0x1c4   :  { %v367_v19 = vadd.f32 %v362_v16, %v318_v13  ;;  %v368_v22 = vadd.f32 %v363_v18, %v319_v14  ;;  %v1521_v24 = vld [vmem:[#allocation2 + $0x10] sm:$0xff] }
 0x1c5   :  { %v584_v50 = vmul.f32 %v1381_v4, %v1521_v24  ;;  %v560_v26 = vmul.f32 %v1401_v23, %v1521_v24  ;;  %v608_v33 = vmul.f32 %v1388_v9, %v1521_v24  ;;  %v632_v38 = vmul.f32 %v1433_v12, %v1521_v24 }
 0x1c6   :  { %v656_v40 = vmul.f32 %v1461_v48, %v1521_v24  ;;  %v680_v44 = vmul.f32 %v1466_v51, %v1521_v24  ;;  %v704_v47 = vmul.f32 %v1469_v56, %v1521_v24  ;;  %v553_v1 = vmul.f32 %v1499_v11, %v1521_v24 }
 0x1c7   :  { %592 = vrot.lane.b32.xlu1 %v584_v50, %s1209_s18  ;;  %568 = vrot.lane.b32.xlu2 %v560_v26, %s1208_s6 }
 0x1cb   :  { %v409_v27 = vpop.permute.xlu1 %408  ;;  %v407_v17 = vpop.permute.xlu0 %406 }
 0x1cc   :  { %v1529_v28 = vadd.f32 %v409_v27, %v369_v15  ;;  %v411_v29 = vsel %vm410_vm7, %v405_v62, %v407_v17  ;;  %v412_v30 = vsel %vm410_vm7, %v407_v17, %v409_v27 }
 0x1cd   :  { %v1533_v31 = vadd.f32 %v411_v29, %v367_v19  ;;  %v1535_v32 = vadd.f32 %v412_v30, %v368_v22 }
 0x1cf   :  { %616 = vrot.lane.b32.xlu1 %v608_v33, %s1210_s19 }
 0x1d3   :  { %v528_v34 = vpop.permute.xlu1 %527  ;;  %v526_v35 = vpop.permute.xlu0 %525 }
 0x1d4   :  { %v1540_v36 = vsel %vm531_vm12, %v528_v34, %v530_v6  ;;  %v532_v37 = vsel %vm531_vm12, %v526_v35, %v528_v34 }
 0x1d5   :  { %v583_v39 = vmul.f32 %v1381_v4, %v1540_v36  ;;  %538 = vst.msk [vmem:[#allocation2] sm:$0xff] %vm537_vm13, %v532_v37  ;;  %v607_v42 = vmul.f32 %v1388_v9, %v1540_v36  ;;  %v631_v45 = vmul.f32 %v1433_v12, %v1540_v36  ;;  %v655_v49 = vmul.f32 %v1461_v48, %v1540_v36 }
 0x1d6   :  { %v559_v53 = vmul.f32 %v1401_v23, %v1540_v36  ;;  %v679_v54 = vmul.f32 %v1466_v51, %v1540_v36  ;;  %v703_v60 = vmul.f32 %v1469_v56, %v1540_v36  ;;  %v727_v59 = vmul.f32 %v1490_v2, %v1540_v36 }
 0x1d7   :  { %640 = vrot.lane.b32.xlu1 %v632_v38, %s1211_s20  ;;  %590 = vrot.lane.b32.xlu0 %v583_v39, %s1209_s18  ;;  %v552_v17 = vmul.f32 %v1499_v11, %v1540_v36 }
 0x1db   :  { %v456_v58 = vpop.permute.xlu0 %455 }
 0x1dc   :  { %v1550_v41 = vld [vmem:[#allocation2] sm:$0xff] }
 0x1dd   :  { %v558_v43 = vmul.f32 %v1401_v23, %v1550_v41  ;;  %v582_v57 = vmul.f32 %v1381_v4, %v1550_v41  ;;  %v606_v55 = vmul.f32 %v1388_v9, %v1550_v41  ;;  %v728_v4 = vmul.f32 %v1490_v2, %v1521_v24 }
 0x1de   :  { %v630_v23 = vmul.f32 %v1433_v12, %v1550_v41  ;;  %v1232_v9 = vmov 31   ;;  %v654_v62 = vmul.f32 %v1461_v48, %v1550_v41  ;;  %v678_v12 = vmul.f32 %v1466_v51, %v1550_v41 }
 0x1df   :  { %664 = vrot.lane.b32.xlu1 %v656_v40, %s1215_s21  ;;  %614 = vrot.lane.b32.xlu0 %v607_v42, %s1210_s19  ;;  %v702_v63 = vmul.f32 %v1469_v56, %v1550_v41  ;;  %v726_v48 = vmul.f32 %v1490_v2, %v1550_v41  ;;  %v551_v30 = vmul.f32 %v1499_v11, %v1550_v41 }
 0x1e0   :  { %564 = vrot.lane.b32.xlu2 %v558_v43, %s1208_s6 }
 0x1e1   :  { %1074 = vset.pattern.permute.xlu2 %v1232_v9 }
 0x1e7   :  { %688 = vrot.lane.b32.xlu1 %v680_v44, %s1216_s22  ;;  %638 = vrot.lane.b32.xlu0 %v631_v45, %s1211_s20 }
 0x1e8   :  { %453 = vrot.lane.b32.xlu2 %v440_v46, %s1218_s24 }
 0x1ef   :  { %712 = vrot.lane.b32.xlu1 %v704_v47, %s1217_s23  ;;  %662 = vrot.lane.b32.xlu0 %v655_v49, %s1215_s21 }
 0x1f0   :  { %588 = vrot.lane.b32.xlu2 %v582_v57, %s1209_s18 }
 0x1f7   :  { %566 = vrot.lane.b32.xlu1 %v559_v53, %s1208_s6  ;;  %686 = vrot.lane.b32.xlu0 %v679_v54, %s1216_s22 }
 0x1f8   :  { %612 = vrot.lane.b32.xlu2 %v606_v55, %s1210_s19 }
 0x1ff   :  { %736 = vrot.lane.b32.xlu1 %v728_v4, %s1218_s24  ;;  %710 = vrot.lane.b32.xlu0 %v703_v60, %s1217_s23 }
 0x200   :  { %636 = vrot.lane.b32.xlu2 %v630_v23, %s1211_s20 }
 0x207   :  { %457 = vrot.lane.b32.xlu1 %v442_v61, %s1218_s24  ;;  %734 = vrot.lane.b32.xlu0 %v727_v59, %s1218_s24  ;;  %v1233_v61 = vmov 0  }
 0x208   :  { %660 = vrot.lane.b32.xlu2 %v654_v62, %s1215_s21  ;;  %1108 = vset.pattern.permute.xlu1 %v1233_v61 }
 0x20f   :  { %486 = vperm.xlu0 %1075, %v1293_v3  }
 0x210   :  { %684 = vrot.lane.b32.xlu2 %v678_v12, %s1216_s22 }
 0x217   :  { %1110 = vset.pattern.permute.xlu0 %v1233_v61 }
 0x218   :  { %708 = vrot.lane.b32.xlu2 %v702_v63, %s1217_s23 }
 0x220   :  { %732 = vrot.lane.b32.xlu2 %v726_v48, %s1218_s24 }
 0x221   :  { %v569_v0 = vpop.permute.xlu2 %568 }
 0x222   :  { %v577_v5 = vadd.f32 %v569_v0, %v553_v1 }
 0x228   :  { %747 = vperm.xlu2 %1074, %v1293_v3  }
 0x230   :  { %1076 = vset.pattern.permute.xlu2 %v1233_v61 }
 0x231   :  { %66 = vperm.xlu2 %1076, %v1293_v3  }
 0x239   :  { %v593_v51 = vpop.permute.xlu1 %592 }
 0x23a   :  { %v565_v8 = vpop.permute.xlu2 %564  ;;  %v601_v54 = vadd.f32 %v593_v51, %v577_v5 }
 0x241   :  { %v617_v13 = vpop.permute.xlu1 %616 }
 0x242   :  { %v454_v14 = vpop.permute.xlu2 %453  ;;  %v625_v60 = vadd.f32 %v617_v13, %v601_v54 }
 0x243   :  { %v460_v56 = vsel %vm459_vm8, %v454_v14, %v456_v58 }
 0x244   :  { %v1619_v6 = vadd.f32 %v460_v56, %v1533_v31 }
 0x249   :  { %v641_v2 = vpop.permute.xlu1 %640  ;;  %v591_v7 = vpop.permute.xlu0 %590 }
 0x24a   :  { %v589_v10 = vpop.permute.xlu2 %588  ;;  %v595_v40 = vsel %vm165_vm2, %v591_v7, %v593_v51  ;;  %v649_v59 = vadd.f32 %v641_v2, %v625_v60 }
 0x24b   :  { %v594_v39 = vsel %vm165_vm2, %v589_v10, %v591_v7  ;;  %vm900_vm2 = vcmask 64512  }
 0x251   :  { %v665_v15 = vpop.permute.xlu1 %664  ;;  %v615_v16 = vpop.permute.xlu0 %614 }
 0x252   :  { %v613_v18 = vpop.permute.xlu2 %612  ;;  %v619_v44 = vsel %vm214_vm3, %v615_v16, %v617_v13  ;;  %v673_v5 = vadd.f32 %v665_v15, %v649_v59 }
 0x253   :  { %v618_v36 = vsel %vm214_vm3, %v613_v18, %v615_v16 }
 0x259   :  { %v689_v19 = vpop.permute.xlu1 %688  ;;  %v639_v22 = vpop.permute.xlu0 %638 }
 0x25a   :  { %v637_v24 = vpop.permute.xlu2 %636  ;;  %v643_v49 = vsel %vm263_vm4, %v639_v22, %v641_v2  ;;  %v697_v14 = vadd.f32 %v689_v19, %v673_v5 }
 0x25b   :  { %v642_v47 = vsel %vm263_vm4, %v637_v24, %v639_v22 }
 0x261   :  { %v713_v50 = vpop.permute.xlu1 %712  ;;  %v663_v26 = vpop.permute.xlu0 %662 }
 0x262   :  { %v661_v27 = vpop.permute.xlu2 %660  ;;  %v667_v4 = vsel %vm312_vm5, %v663_v26, %v665_v15  ;;  %v721_v10 = vadd.f32 %v713_v50, %v697_v14 }
 0x263   :  { %v666_v55 = vsel %vm312_vm5, %v661_v27, %v663_v26  ;;  %v1234_v26 = vmov 1   ;;  %vm971_vm5 = vcmask 261120  }
 0x264   :  { %1087 = vset.pattern.permute.xlu2 %v1234_v26 }
 0x269   :  { %v567_v29 = vpop.permute.xlu1 %566  ;;  %v687_v31 = vpop.permute.xlu0 %686 }
 0x26a   :  { %v570_v33 = vsel %vm116_vm1, %v565_v8, %v567_v29  ;;  %v571_v34 = vsel %vm116_vm1, %v567_v29, %v569_v0  ;;  %v685_v35 = vpop.permute.xlu2 %684  ;;  %v691_v48 = vsel %vm361_vm6, %v687_v31, %v689_v19 }
 0x26b   :  { %v575_v37 = vadd.f32 %v570_v33, %v551_v30  ;;  %v576_v38 = vadd.f32 %v571_v34, %v552_v17  ;;  %v690_v63 = vsel %vm361_vm6, %v685_v35, %v687_v31  ;;  %v1111_v17 = vld [vmem:[%s1681_s1] sm:$0xff]  ;;  %s1237_s1 = smov 74  }
 0x26c   :  { %73 = vperm.xlu2 %1087, %v1111_v17  }
 0x26d   :  { %v599_v42 = vadd.f32 %v594_v39, %v575_v37  ;;  %v600_v43 = vadd.f32 %v595_v40, %v576_v38 }
 0x26f   :  { %v623_v45 = vadd.f32 %v618_v36, %v599_v42  ;;  %v624_v11 = vadd.f32 %v619_v44, %v600_v43 }
 0x271   :  { %v737_v41 = vpop.permute.xlu1 %736  ;;  %v711_v46 = vpop.permute.xlu0 %710  ;;  %v647_v52 = vadd.f32 %v642_v47, %v623_v45  ;;  %v648_v53 = vadd.f32 %v643_v49, %v624_v11 }
 0x272   :  { %v709_v57 = vpop.permute.xlu2 %708  ;;  %v715_v56 = vsel %vm410_vm7, %v711_v46, %v713_v50  ;;  %v745_v22 = vadd.f32 %v737_v41, %v721_v10  ;;  %v894_v10 = vld [vmem:[%s1685_s5] sm:$0xff] }
 0x273   :  { %v671_v23 = vadd.f32 %v666_v55, %v647_v52  ;;  %v672_v9 = vadd.f32 %v667_v4, %v648_v53  ;;  %v714_v2 = vsel %vm410_vm7, %v709_v57, %v711_v46 }
 0x274   :  { %1109 = vset.pattern.permute.xlu2 %v1233_v61 }
 0x275   :  { %v695_v51 = vadd.f32 %v690_v63, %v671_v23  ;;  %v696_v8 = vadd.f32 %v691_v48, %v672_v9 }
 0x277   :  { %v719_v16 = vadd.f32 %v714_v2, %v695_v51  ;;  %v720_v18 = vadd.f32 %v715_v56, %v696_v8  ;;  %v776_v56 = vld [vmem:[%s1682_s2] sm:$0xff] }
 0x279   :  { %v458_v62 = vpop.permute.xlu1 %457  ;;  %v735_v12 = vpop.permute.xlu0 %734 }
 0x27a   :  { %v461_v1 = vsel %vm459_vm8, %v456_v58, %v458_v62  ;;  %v733_v0 = vpop.permute.xlu2 %732  ;;  %v739_v7 = vsel %vm459_vm8, %v735_v12, %v737_v41  ;;  %v467_v34 = vadd.f32 %v458_v62, %v1529_v28 }
 0x27b   :  { %v466_v13 = vadd.f32 %v461_v1, %v1535_v32  ;;  %v738_v3 = vsel %vm459_vm8, %v733_v0, %v735_v12  ;;  %v744_v24 = vadd.f32 %v739_v7, %v720_v18 }
 0x27c   :  { %v743_v58 = vadd.f32 %v738_v3, %v719_v16 }
 0x281   :  { %v487_v15 = vpop.permute.xlu0 %486 }
 0x282   :  { %v748_v27 = vpop.permute.xlu2 %747  ;;  %v489_v32 = vadd.f32 %v487_v15, %v1619_v6  ;;  %v490_v19 = vadd.f32 %v487_v15, %v466_v13  ;;  %v491_v6 = vadd.f32 %v487_v15, %v467_v34  ;;  %v893_v15 = vld [vmem:[#allocation7] sm:$0xff]  ;;  %v965_v34 = vstv %s1687_s7 }
 0x283   :  { %v752_v29 = vadd.f32 %v748_v27, %v745_v22  ;;  %v750_v30 = vadd.f32 %v748_v27, %v743_v58  ;;  %v751_v50 = vadd.f32 %v748_v27, %v744_v24 }
 0x284   :  { %v1082_v31 = vpack.i.bf16 %v490_v19, %v489_v32 }
 0x285   :  { %771 = vrot.lane.b32.xlu0 %v752_v29, %s1235_s28  ;;  %v1077_v33 = vpack.i.bf16 %v751_v50, %v750_v30 }
 0x287   :  { %1078 = vrot.lane.b32.xlu1 %v1077_v33, %s1235_s28 }
 0x28b   :  { %v67_v35 = vpop.permute.xlu2 %66 }
 0x28c   :  { %v69_v37 = vmul.f32 %v67_v35, %v1313_v20  ;;  %v70_v38 = vmul.f32 %v67_v35, %v1315_v21  ;;  %v71_v57 = vmul.f32 %v67_v35, %v1321_v25  ;;  %v777_v25 = vld [vmem:[%s1683_s3] sm:$0xff] }
 0x28f   :  { %1083 = vrot.lane.b32.xlu1 %v1082_v31, %s1236_s29 }
 0x297   :  { %760 = vrot.lane.b32.xlu1 %v491_v6, %s1236_s29 }
 0x2c6   :  { %v74_v39 = vpop.permute.xlu2 %73 }
 0x2c7   :  { %v76_v40 = vadd.f32 %v74_v39, %v69_v37  ;;  %v77_v42 = vadd.f32 %v74_v39, %v70_v38  ;;  %v78_v4 = vadd.f32 %v74_v39, %v71_v57 }
 0x2c9   :  { %v1093_v43 = vpack.i.bf16 %v77_v42, %v76_v40 }
 0x2cb   :  { %1094 = vrot.lane.b32.xlu1 %v1093_v43, %s1237_s1 }
 0x2d3   :  { %780 = vperm.xlu1 %1108, %v777_v25  }
 0x2f7   :  { %v772_v49 = vpop.permute.xlu0 %771 }
 0x2f9   :  { %v1079_v36 = vpop.permute.xlu1 %1078 }
 0x2fa   :  { %v1081_v44 = vunpack.i.h.bf16 %v1079_v36  ;;  %v1080_v45 = vunpack.i.l.bf16 %v1079_v36 }
 0x2fc   :  { %v774_v11 = vsel %vm773_vm14, %v1080_v45, %v1081_v44  ;;  %v775_v54 = vsel %vm773_vm14, %v1081_v44, %v772_v49 }
 0x2fd   :  { %v1098_v28 = vpack.i.bf16 %v774_v11, %v1080_v45 }
 0x2ff   :  { %1099 = vrot.lane.b32.xlu2 %v1098_v28, %s1237_s1 }
 0x301   :  { %v1084_v41 = vpop.permute.xlu1 %1083 }
 0x302   :  { %v1086_v46 = vunpack.i.h.bf16 %v1084_v41  ;;  %v1085_v47 = vunpack.i.l.bf16 %v1084_v41 }
 0x304   :  { %v762_v20 = vsel %vm518_vm10, %v1085_v47, %v1086_v46 }
 0x305   :  { %v1088_v21 = vpack.i.bf16 %v762_v20, %v1085_v47 }
 0x307   :  { %1089 = vrot.lane.b32.xlu0 %v1088_v21, %s1237_s1 }
 0x309   :  { %v761_v52 = vpop.permute.xlu1 %760 }
 0x30a   :  { %v763_v53 = vsel %vm518_vm10, %v1086_v46, %v761_v52 }
 0x30b   :  { %v1103_v55 = vpack.i.bf16 %v763_v53, %v775_v54 }
 0x30d   :  { %1104 = vrot.lane.b32.xlu2 %v1103_v55, %s1237_s1 }
 0x30f   :  { %790 = vrot.lane.b32.xlu0 %v78_v4, %s1237_s1 }
 0x315   :  { %897 = vperm.xlu2 %1109, %v894_v10  }
 0x33d   :  { %v1095_v48 = vpop.permute.xlu1 %1094 }
 0x33e   :  { %v1097_v0 = vunpack.i.h.bf16 %v1095_v48  ;;  %v1096_v5 = vunpack.i.l.bf16 %v1095_v48 }
 0x340   :  { %v805_v2 = vsel %vm804_vm15, %v1096_v5, %v1097_v0 }
 0x345   :  { %v781_v16 = vpop.permute.xlu1 %780 }
 0x359   :  { %v1100_v60 = vpop.permute.xlu2 %1099 }
 0x35a   :  { %v1102_v23 = vunpack.i.h.bf16 %v1100_v60  ;;  %v1101_v9 = vunpack.i.l.bf16 %v1100_v60 }
 0x35c   :  { %v809_v61 = vsel %vm804_vm15, %v1101_v9, %v1102_v23 }
 0x35d   :  { %837 = vmatpush.msra.mxu0 %v809_v61 }
 0x367   :  { %v1105_v59 = vpop.permute.xlu2 %1104 }
 0x368   :  { %v1106_v62 = vunpack.i.l.bf16 %v1105_v59  ;;  %v1107_v63 = vunpack.i.h.bf16 %v1105_v59 }
 0x36a   :  { %877 = vmatpush.msra.mxu2 %v1106_v62  ;;  %v810_v12 = vsel %vm804_vm15, %v1102_v23, %v1106_v62 }
 0x36b   :  { %857 = vmatpush.msra.mxu1 %v810_v12 }
 0x36c   :  { %878 = vmatpush.msra.mxu2 %v1107_v63 }
 0x36f   :  { %v898_v31 = vpop.permute.xlu2 %897 }
 0x379   :  { %v1090_v1 = vpop.permute.xlu0 %1089 }
 0x37a   :  { %v1092_v51 = vunpack.i.h.bf16 %v1090_v1  ;;  %v1091_v8 = vunpack.i.l.bf16 %v1090_v1 }
 0x37c   :  { %v807_v13 = vsel %vm804_vm15, %v1091_v8, %v1092_v51  ;;  %v808_v14 = vsel %vm804_vm15, %v1092_v51, %v1107_v63 }
 0x37d   :  { %838 = vmatpush.msra.mxu0 %v807_v13  ;;  %858 = vmatpush.msra.mxu1 %v808_v14 }
 0x37f   :  { %839 = vmatpush.msra.mxu0 %v805_v2 }
 0x380   :  { %991 = vmatmul.msk.f32.vlgmr.msra.gmra.mxu0 %vm820_vm0, %v776_v56 }
 0x381   :  { %v791_v3 = vpop.permute.xlu0 %790 }
 0x382   :  { %879 = vmatpush.msra.mxu2 %v791_v3  ;;  %v806_v7 = vsel %vm804_vm15, %v1097_v0, %v791_v3 }
 0x383   :  { %859 = vmatpush.msra.mxu1 %v806_v7  ;;  %993 = vmatmul.msk.f32.vlgmr.msra.gmra.mxu2 %vm820_vm0, %v776_v56 }
 0x384   :  { %992 = vmatmul.msk.f32.vlgmr.msra.gmra.mxu1 %vm820_vm0, %v776_v56 }
 0x3fd   :  { %v841_v18 = vpop.f32.mrf.mxu0 }
 0x3fe   :  { %v842_v22 = vadd.f32 %v841_v18, %v781_v16 }
 0x400   :  { %vm884_vm1 = vcmp.ge.f32.partialorder %v842_v22, 0.0  ;;  %v887_v58 = vmul.f32 0.1, %v842_v22 }
 0x401   :  { %v861_v24 = vpop.f32.mrf.mxu1 }
 0x402   :  { %v862_v26 = vadd.f32 %v861_v24, %v781_v16  ;;  %v890_v27 = vsel %vm884_vm1, %v842_v22, %v887_v58 }
 0x403   :  { %919 = vmatpush.msra.mxu3 %v890_v27 }
 0x404   :  { %994 = vmatmul.msk.f32.vlgmr.msra.gmra.mxu3 %vm900_vm2, %v893_v15  ;;  %vm885_vm3 = vcmp.ge.f32.partialorder %v862_v26, 0.0  ;;  %v888_v32 = vmul.f32 0.1, %v862_v26 }
 0x406   :  { %v881_v19 = vpop.f32.mrf.mxu2  ;;  %v891_v17 = vsel %vm885_vm3, %v862_v26, %v888_v32 }
 0x407   :  { %v882_v29 = vadd.f32 %v881_v19, %v781_v16  ;;  %939 = vmatpush.msrb.mxu3 %v891_v17 }
 0x409   :  { %vm886_vm4 = vcmp.ge.f32.partialorder %v882_v29, 0.0  ;;  %v889_v30 = vmul.f32 0.1, %v882_v29 }
 0x40b   :  { %v892_v50 = vsel %vm886_vm4, %v882_v29, %v889_v30 }
 0x40c   :  { %959 = vmatpush.msrb.mxu0 %v892_v50  ;;  %995 = vmatmul.msk.f32.vlgmr.msrb.gmra.mxu3 %vm900_vm2, %v893_v15 }
 0x40d   :  { %996 = vmatmul.msk.f32.vlgmr.msrb.gmra.mxu0 %vm900_vm2, %v893_v15 }
 0x487   :  { %v921_v33 = vpop.f32.mrf.mxu3 }
 0x488   :  { %v922_v6 = vadd.f32 %v921_v33, %v898_v31 }
 0x48a   :  { %v966_v35 = vmul.f32 %v965_v34, %v922_v6  ;;  %v961_v37 = vpop.f32.mrf.mxu0 }
 0x48b   :  { %v962_v38 = vadd.f32 %v961_v37, %v898_v31 }
 0x48c   :  { %969 = vst [vmem:[#allocation9] sm:$0xff] %v966_v35 }
 0x48d   :  { %v968_v39 = vmul.f32 %v965_v34, %v962_v38 }
 0x48f   :  { %v941_v40 = vpop.f32.mrf.mxu3  ;;  %972 = vst.msk [vmem:[#allocation9 + $0x10] sm:$0xff] %vm971_vm5, %v968_v39 }
 0x490   :  { %v942_v42 = vadd.f32 %v941_v40, %v898_v31 }
 0x492   :  { %v967_v43 = vmul.f32 %v965_v34, %v942_v42 }
 0x494   :  { %970 = vst [vmem:[#allocation9 + $0x8] sm:$0xff] %v967_v43 }
 0x495   :  { %983 = dma.vmem_to_hbm [thread:$0]  %s979_s14, 384, %s981_s4, [#allocation6]  }
 0x496   :  { %1188 = dma.done.wait [#allocation6], 384  }
 0x497   :  { %1189 = vsyncadd [#allocation6], 4294966912 }
 0x498   :  { %988 = vsyncpa [#allocation5], 1 }
 0x499   :  { %989 = vsyncpa [#allocation8], 1 }
 0x49a   :  { %990 = vsyncpa [#allocation6], 1 }

</bundles_post_ra>
